<compile_context>
chip_gen: v7x
topology: tpu7x:2x2x1
jax: 0.10.0
libtpu: 0.0.40
codegen_flags: <defaults>
</compile_context>

<pallas_src>
import functools

import jax
import jax.numpy as jnp
from jax.experimental import pallas as pl
from jax.experimental.pallas import tpu as pltpu

LANE = 128


def _round_up(x, m):
    return ((x + m - 1) // m) * m


def _cdiv(a, b):
    return -(-a // b)


def _device_vmem_bytes():
    """Physical per-core VMEM; conservative fallback if the query is unavailable."""
    try:
        return int(pltpu.get_tpu_info().vmem_capacity_bytes)
    except Exception:
        return 64 << 20  # v7x per-TensorCore (smallest of current generations)


# --------------------------------------------------------------------------- #
# Kernel: one (encoder, batch-tile) grid step of the fused translator chain.
# --------------------------------------------------------------------------- #
def _fused_translator_kernel(x_ref, inw_ref, inb_ref, tw_ref, tb_ref,
                             outw_ref, outb_ref, o_ref, *, depth):
    cdt = inw_ref.dtype  # matmul-operand dtype (bf16 or f32)

    # ---- in adapter: [tb, d_enc_pad] @ [d_enc_pad, d_ad_pad] + b ----
    h = jnp.dot(x_ref[...].astype(cdt), inw_ref[...],
                preferred_element_type=jnp.float32)
    # f32 bias-add (v5e-safe), then keep the inter-layer activation narrow.
    h = (h + inb_ref[...]).astype(cdt)

    # ---- shared transform: depth x (Linear + ReLU), f32 accumulation ----
    for l in range(depth):               # static unroll (depth is a Python int)
        h = jnp.dot(h, tw_ref[l], preferred_element_type=jnp.float32)
        h = jnp.maximum(h + tb_ref[l], 0.0).astype(cdt)

    # ---- out adapter: [tb, d_ad_pad] @ [d_ad_pad, d_enc_pad] + b ----
    y = jnp.dot(h, outw_ref[...], preferred_element_type=jnp.float32)
    o_ref[...] = (y + outb_ref[...]).astype(o_ref.dtype)


# --------------------------------------------------------------------------- #
# Fused pallas_call over (encoders-in-group, batch tiles).
# --------------------------------------------------------------------------- #
def _fused_forward(x_stacked, in_w, in_b, t_w, t_b, out_w, out_b,
                   *, depth, tile_b, out_dtype, vmem_limit_bytes,
                   single_buffer_weights=True):
    n, b_pad, d_enc_pad = x_stacked.shape
    d_ad_pad = in_w.shape[-1]
    n_bt = b_pad // tile_b

    def weight_spec(block_shape, index_map):
        # Resident weights: single buffer (their block index never changes
        # along the inner batch axis, so the second pipeline buffer is wasted).
        if single_buffer_weights:
            try:
                return pl.BlockSpec(block_shape, index_map,
                                    pipeline_mode=pl.Buffered(1))
            except (TypeError, AttributeError):
                pass
        return pl.BlockSpec(block_shape, index_map)

    kernel = functools.partial(_fused_translator_kernel, depth=depth)

    return pl.pallas_call(
        kernel,
        out_shape=jax.ShapeDtypeStruct((n, b_pad, d_enc_pad), out_dtype),
        grid_spec=pltpu.PrefetchScalarGridSpec(
            num_scalar_prefetch=0,
            grid=(n, n_bt),
            in_specs=[
                # activations: new tile every (encoder, batch) step -> pipelined
                pl.BlockSpec((None, tile_b, d_enc_pad), lambda e, b: (e, b, 0)),
                # per-encoder in adapter (resident across batch tiles)
                weight_spec((None, d_enc_pad, d_ad_pad), lambda e, b: (e, 0, 0)),
                weight_spec((None, 1, d_ad_pad),         lambda e, b: (e, 0, 0)),
                # shared transform stack (resident across the entire grid)
                weight_spec((depth, d_ad_pad, d_ad_pad), lambda e, b: (0, 0, 0)),
                weight_spec((depth, 1, d_ad_pad),        lambda e, b: (0, 0, 0)),
                # per-encoder out adapter (resident across batch tiles)
                weight_spec((None, d_ad_pad, d_enc_pad), lambda e, b: (e, 0, 0)),
                weight_spec((None, 1, d_enc_pad),        lambda e, b: (e, 0, 0)),
            ],
            out_specs=pl.BlockSpec((None, tile_b, d_enc_pad),
                                   lambda e, b: (e, b, 0)),
        ),
        compiler_params=pltpu.CompilerParams(
            # No accumulation across either grid axis -> both legally parallel;
            # lets v7x megacore shard over encoders even when n_bt == 1.
            dimension_semantics=("parallel", "parallel"),
            vmem_limit_bytes=vmem_limit_bytes),
    )(x_stacked, in_w, in_b, t_w, t_b, out_w, out_b)


# --------------------------------------------------------------------------- #
# Parameter construction: grouped+padded (kernel layout) and raw (reference).
# --------------------------------------------------------------------------- #
def init_params(encoder_dims, d_adapter, depth=3, seed=0,
                compute_dtype=jnp.bfloat16):
    names = list(encoder_dims.keys())
    d_ad_pad = _round_up(d_adapter, LANE)

    key = jax.random.PRNGKey(seed)
    raw = {"in": {}, "out": {}, "t_w": [], "t_b": []}

    # shared transform stack
    tw_p, tb_p = [], []
    for _ in range(depth):
        key, kw = jax.random.split(key)
        w = jax.random.normal(kw, (d_adapter, d_adapter), jnp.float32)
        w = w * (1.0 / jnp.sqrt(d_adapter))
        b = jnp.zeros((1, d_adapter), jnp.float32)
        raw["t_w"].append(w)
        raw["t_b"].append(b)
        tw_p.append(jnp.pad(w, ((0, d_ad_pad - d_adapter),
                                (0, d_ad_pad - d_adapter))))
        tb_p.append(jnp.pad(b, ((0, 0), (0, d_ad_pad - d_adapter))))

    # per-encoder adapters (raw)
    for name in names:
        d_enc = encoder_dims[name]
        key, k1, k2 = jax.random.split(key, 3)
        in_w = jax.random.normal(k1, (d_enc, d_adapter), jnp.float32)
        in_w = in_w * (1.0 / jnp.sqrt(d_enc))
        in_b = jnp.zeros((1, d_adapter), jnp.float32)
        out_w = jax.random.normal(k2, (d_adapter, d_enc), jnp.float32)
        out_w = out_w * (1.0 / jnp.sqrt(d_adapter))
        out_b = jnp.zeros((1, d_enc), jnp.float32)
        raw["in"][name] = (in_w, in_b)
        raw["out"][name] = (out_w, out_b)

    # group encoders by their OWN padded width: small encoders never pay the
    # largest encoder's padded K/N in the adapter matmuls.
    by_pad = {}
    for name in names:
        by_pad.setdefault(_round_up(encoder_dims[name], LANE), []).append(name)

    groups = []
    for d_enc_pad, gnames in sorted(by_pad.items()):
        inw_p, inb_p, outw_p, outb_p = [], [], [], []
        for name in gnames:
            d_enc = encoder_dims[name]
            in_w, in_b = raw["in"][name]
            out_w, out_b = raw["out"][name]
            inw_p.append(jnp.pad(in_w, ((0, d_enc_pad - d_enc),
                                        (0, d_ad_pad - d_adapter))))
            inb_p.append(jnp.pad(in_b, ((0, 0), (0, d_ad_pad - d_adapter))))
            outw_p.append(jnp.pad(out_w, ((0, d_ad_pad - d_adapter),
                                          (0, d_enc_pad - d_enc))))
            outb_p.append(jnp.pad(out_b, ((0, 0), (0, d_enc_pad - d_enc))))
        groups.append({
            "names": gnames,
            "d_enc_pad": d_enc_pad,
            # matmul operands stored in compute dtype (halves HBM/VMEM traffic)
            "in_w": jnp.stack(inw_p).astype(compute_dtype),
            "out_w": jnp.stack(outw_p).astype(compute_dtype),
            # biases stay f32 (bias-add / ReLU done in f32)
            "in_b": jnp.stack(inb_p),
            "out_b": jnp.stack(outb_p),
        })

    return {
        "names": names,
        "enc_dims": dict(encoder_dims),
        "depth": depth,
        "d_adapter": d_adapter,
        "d_ad_pad": d_ad_pad,
        "compute_dtype": compute_dtype,
        "t_w": jnp.stack(tw_p).astype(compute_dtype),
        "t_b": jnp.stack(tb_p),
        "groups": groups,
        "raw": raw,
    }


# --------------------------------------------------------------------------- #
# forward(ins: dict[name -> [B, d_enc]]) -> dict[name -> [B, d_enc]]
# --------------------------------------------------------------------------- #
def abs_n_translator_forward(ins, params):
    enc_dims = params["enc_dims"]
    depth = params["depth"]
    d_ad_pad = params["d_ad_pad"]
    cdt = params["compute_dtype"]
    t_w, t_b = params["t_w"], params["t_b"]

    batches = {ins[n].shape[0] for n in params["names"]}
    assert len(batches) == 1, "all encoders must share a batch size"
    batch = batches.pop()

    vmem_cap = _device_vmem_bytes()
    x_item = jnp.dtype(cdt).itemsize

    outs = {}
    for grp in params["groups"]:
        gnames = grp["names"]
        ng = len(gnames)
        d_enc_pad = grp["d_enc_pad"]
        out_dtype = ins[gnames[0]].dtype
        assert all(ins[n].dtype == out_dtype for n in gnames), \
            "encoders sharing a padded width must share an input dtype"
        out_item = jnp.dtype(out_dtype).itemsize

        # --- VMEM budget: resident (single-buffered) weight blocks ---
        weight_bytes = (t_w.nbytes + t_b.nbytes
                        + grp["in_w"].nbytes // ng + grp["in_b"].nbytes // ng
                        + grp["out_w"].nbytes // ng + grp["out_b"].nbytes // ng)

        # per-batch-row cost: x/out tiles double-buffered + f32/bf16 intermediates
        per_row = (2 * d_enc_pad * x_item + 2 * d_enc_pad * out_item
                   + 6 * d_ad_pad + 4 * d_enc_pad)

        # sublane alignment: bf16 packs 16 rows per vreg, f32 packs 8
        align = 16 if min(x_item, out_item) < 4 else 8

        headroom = 8 << 20
        avail = vmem_cap - weight_bytes - headroom
        cap_rows = avail // per_row if avail > 0 else align
        cap_rows = max(align, min(1024, cap_rows))
        cap_rows = (cap_rows // align) * align

        # tile_b chosen to minimize last-tile padding under the budget cap
        n_tiles = _cdiv(batch, cap_rows)
        tile_b = min(cap_rows, _round_up(_cdiv(batch, n_tiles), align))
        b_pad = _round_up(batch, tile_b)

        vmem_limit = int(min(vmem_cap,
                             max(32 << 20,
                                 weight_bytes + tile_b * per_row + headroom)))

        def _pad2(x, rows, cols):
            return x if (rows == 0 and cols == 0) else jnp.pad(
                x, ((0, rows), (0, cols)))

        # TODO(synk): for fully aligned, homogeneous inputs this stack/pad copy
        # (an extra HBM read+write of activations) could be skipped entirely.
        x_stacked = jnp.stack([
            _pad2(ins[name], b_pad - batch, d_enc_pad - enc_dims[name])
            for name in gnames
        ]).astype(cdt)

        run = functools.partial(
            _fused_forward, x_stacked, grp["in_w"], grp["in_b"], t_w, t_b,
            grp["out_w"], grp["out_b"],
            depth=depth, tile_b=tile_b, out_dtype=out_dtype,
            vmem_limit_bytes=vmem_limit)
        try:
            out = run(single_buffer_weights=True)
        except Exception:
            # Fallback for jax versions without Buffered(1) support in lowering.
            out = run(single_buffer_weights=False)

        for i, name in enumerate(gnames):
            outs[name] = out[i, :batch, :enc_dims[name]]

    return {name: outs[name] for name in params["names"]}


# --------------------------------------------------------------------------- #
# Pure-JAX reference (mirrors the kernel's bf16-operand / f32-accumulate math).
# --------------------------------------------------------------------------- #
def _reference_forward(ins, params):
    cd = params["compute_dtype"]
    raw = params["raw"]

    def q(a):  # same rounding the kernel applies to matmul operands
        return a.astype(cd).astype(jnp.float32)

    outs = {}
    for name in params["names"]:
        x = ins[name]
        in_w, in_b = raw["in"][name]
        out_w, out_b = raw["out"][name]
        h = q(x) @ q(in_w) + in_b
        for w, b in zip(raw["t_w"], raw["t_b"]):
            h = jnp.maximum(q(h) @ q(w) + b, 0.0)
        outs[name] = (q(h) @ q(out_w) + out_b).astype(x.dtype)
    return outs


if __name__ == "__main__":
    # small shapes: 2 encoders, batch=8, d_adapter=64, depth=3
    encoder_dims = {"text": 32, "vision": 48}
    d_adapter = 64
    batch = 8
    depth = 3

    params = init_params(encoder_dims, d_adapter, depth=depth, seed=0)

    key = jax.random.PRNGKey(0)
    ins = {}
    for name, d_enc in encoder_dims.items():
        key, sub = jax.random.split(key)
        ins[name] = jax.random.normal(sub, (batch, d_enc), jnp.float32)

    outs = abs_n_translator_forward(ins, params)
    outs = jax.tree_util.tree_map(jax.block_until_ready, outs)

    refs = _reference_forward(ins, params)
    for name in encoder_dims:
        assert outs[name].shape == ins[name].shape
        assert outs[name].dtype == ins[name].dtype
        err = float(jnp.max(jnp.abs(outs[name].astype(jnp.float32)
                                    - refs[name].astype(jnp.float32))))
        assert err < 1e-3, f"{name}: max abs err {err}"

    print("KERNEL_OK")
</pallas_src>

<mosaic_0001>
module attributes {stable_mosaic.version = 11 : i64} {
  func.func @_fused_translator_kernel(%arg0: i32, %arg1: i32, %arg2: memref<1x16x128xbf16, #tpu.memory_space<vmem>>, %arg3: memref<1x128x128xbf16, #tpu.memory_space<vmem>>, %arg4: memref<1x1x128xf32, #tpu.memory_space<vmem>>, %arg5: memref<3x128x128xbf16, #tpu.memory_space<vmem>>, %arg6: memref<3x1x128xf32, #tpu.memory_space<vmem>>, %arg7: memref<1x128x128xbf16, #tpu.memory_space<vmem>>, %arg8: memref<1x1x128xf32, #tpu.memory_space<vmem>>, %arg9: memref<1x16x128xf32, #tpu.memory_space<vmem>>) attributes {dimension_semantics = [#tpu.dimension_semantics<parallel>, #tpu.dimension_semantics<parallel>], iteration_bounds = array<i64: 2, 1>, scalar_prefetch = 0 : i64, scratch_operands = 0 : i64, tpu.core_type = #tpu.core_type<tc>, window_params = [{transform_indices = @transform_0, window_bounds = array<i64: 1, 16, 128>}, {pipeline_mode = #tpu.pipeline_mode<synchronous>, transform_indices = @transform_1, window_bounds = array<i64: 1, 128, 128>}, {pipeline_mode = #tpu.pipeline_mode<synchronous>, transform_indices = @transform_2, window_bounds = array<i64: 1, 1, 128>}, {pipeline_mode = #tpu.pipeline_mode<synchronous>, transform_indices = @transform_3, window_bounds = array<i64: 3, 128, 128>}, {pipeline_mode = #tpu.pipeline_mode<synchronous>, transform_indices = @transform_4, window_bounds = array<i64: 3, 1, 128>}, {pipeline_mode = #tpu.pipeline_mode<synchronous>, transform_indices = @transform_5, window_bounds = array<i64: 1, 128, 128>}, {pipeline_mode = #tpu.pipeline_mode<synchronous>, transform_indices = @transform_6, window_bounds = array<i64: 1, 1, 128>}, {transform_indices = @transform_7, window_bounds = array<i64: 1, 16, 128>}]} {
    %c0 = arith.constant 0 : index
    %c0_0 = arith.constant 0 : index
    %c0_1 = arith.constant 0 : index
    %0 = vector.load %arg2[%c0, %c0_0, %c0_1] : memref<1x16x128xbf16, #tpu.memory_space<vmem>>, vector<1x16x128xbf16>
    %1 = vector.shape_cast %0 : vector<1x16x128xbf16> to vector<16x128xbf16>
    %c0_2 = arith.constant 0 : index
    %c0_3 = arith.constant 0 : index
    %c0_4 = arith.constant 0 : index
    %2 = vector.load %arg3[%c0_2, %c0_3, %c0_4] : memref<1x128x128xbf16, #tpu.memory_space<vmem>>, vector<1x128x128xbf16>
    %3 = vector.shape_cast %2 : vector<1x128x128xbf16> to vector<128x128xbf16>
    %cst = arith.constant dense<0.000000e+00> : vector<16x128xf32>
    %4 = tpu.matmul %1, %3, %cst {dimension_numbers = #tpu.dot_dimension_numbers<[1], [0], [0], [1], [0, 0, 1, 1], [], []>} : vector<16x128xbf16>, vector<128x128xbf16>, vector<16x128xf32> -> vector<16x128xf32>
    %c0_5 = arith.constant 0 : index
    %c0_6 = arith.constant 0 : index
    %c0_7 = arith.constant 0 : index
    %5 = vector.load %arg4[%c0_5, %c0_6, %c0_7] : memref<1x1x128xf32, #tpu.memory_space<vmem>>, vector<1x1x128xf32>
    %6 = vector.shape_cast %5 : vector<1x1x128xf32> to vector<1x128xf32>
    %7 = vector.broadcast %6 : vector<1x128xf32> to vector<16x128xf32>
    %8 = arith.addf %4, %7 : vector<16x128xf32>
    %9 = arith.truncf %8 : vector<16x128xf32> to vector<16x128xbf16>
    %c0_8 = arith.constant 0 : index
    %c0_9 = arith.constant 0 : index
    %c0_10 = arith.constant 0 : index
    %10 = vector.load %arg5[%c0_8, %c0_9, %c0_10] : memref<3x128x128xbf16, #tpu.memory_space<vmem>>, vector<1x128x128xbf16>
    %11 = vector.shape_cast %10 : vector<1x128x128xbf16> to vector<128x128xbf16>
    %cst_11 = arith.constant dense<0.000000e+00> : vector<16x128xf32>
    %12 = tpu.matmul %9, %11, %cst_11 {dimension_numbers = #tpu.dot_dimension_numbers<[1], [0], [0], [1], [0, 0, 1, 1], [], []>} : vector<16x128xbf16>, vector<128x128xbf16>, vector<16x128xf32> -> vector<16x128xf32>
    %c0_12 = arith.constant 0 : index
    %c0_13 = arith.constant 0 : index
    %c0_14 = arith.constant 0 : index
    %13 = vector.load %arg6[%c0_12, %c0_13, %c0_14] : memref<3x1x128xf32, #tpu.memory_space<vmem>>, vector<1x1x128xf32>
    %14 = vector.shape_cast %13 : vector<1x1x128xf32> to vector<1x128xf32>
    %15 = vector.broadcast %14 : vector<1x128xf32> to vector<16x128xf32>
    %16 = arith.addf %12, %15 : vector<16x128xf32>
    %cst_15 = arith.constant 0.000000e+00 : f32
    %17 = vector.broadcast %cst_15 : f32 to vector<16x128xf32>
    %18 = arith.maximumf %16, %17 : vector<16x128xf32>
    %19 = arith.truncf %18 : vector<16x128xf32> to vector<16x128xbf16>
    %c1 = arith.constant 1 : index
    %c0_16 = arith.constant 0 : index
    %c0_17 = arith.constant 0 : index
    %20 = vector.load %arg5[%c1, %c0_16, %c0_17] : memref<3x128x128xbf16, #tpu.memory_space<vmem>>, vector<1x128x128xbf16>
    %21 = vector.shape_cast %20 : vector<1x128x128xbf16> to vector<128x128xbf16>
    %cst_18 = arith.constant dense<0.000000e+00> : vector<16x128xf32>
    %22 = tpu.matmul %19, %21, %cst_18 {dimension_numbers = #tpu.dot_dimension_numbers<[1], [0], [0], [1], [0, 0, 1, 1], [], []>} : vector<16x128xbf16>, vector<128x128xbf16>, vector<16x128xf32> -> vector<16x128xf32>
    %c1_19 = arith.constant 1 : index
    %c0_20 = arith.constant 0 : index
    %c0_21 = arith.constant 0 : index
    %23 = vector.load %arg6[%c1_19, %c0_20, %c0_21] : memref<3x1x128xf32, #tpu.memory_space<vmem>>, vector<1x1x128xf32>
    %24 = vector.shape_cast %23 : vector<1x1x128xf32> to vector<1x128xf32>
    %25 = vector.broadcast %24 : vector<1x128xf32> to vector<16x128xf32>
    %26 = arith.addf %22, %25 : vector<16x128xf32>
    %cst_22 = arith.constant 0.000000e+00 : f32
    %27 = vector.broadcast %cst_22 : f32 to vector<16x128xf32>
    %28 = arith.maximumf %26, %27 : vector<16x128xf32>
    %29 = arith.truncf %28 : vector<16x128xf32> to vector<16x128xbf16>
    %c2 = arith.constant 2 : index
    %c0_23 = arith.constant 0 : index
    %c0_24 = arith.constant 0 : index
    %30 = vector.load %arg5[%c2, %c0_23, %c0_24] : memref<3x128x128xbf16, #tpu.memory_space<vmem>>, vector<1x128x128xbf16>
    %31 = vector.shape_cast %30 : vector<1x128x128xbf16> to vector<128x128xbf16>
    %cst_25 = arith.constant dense<0.000000e+00> : vector<16x128xf32>
    %32 = tpu.matmul %29, %31, %cst_25 {dimension_numbers = #tpu.dot_dimension_numbers<[1], [0], [0], [1], [0, 0, 1, 1], [], []>} : vector<16x128xbf16>, vector<128x128xbf16>, vector<16x128xf32> -> vector<16x128xf32>
    %c2_26 = arith.constant 2 : index
    %c0_27 = arith.constant 0 : index
    %c0_28 = arith.constant 0 : index
    %33 = vector.load %arg6[%c2_26, %c0_27, %c0_28] : memref<3x1x128xf32, #tpu.memory_space<vmem>>, vector<1x1x128xf32>
    %34 = vector.shape_cast %33 : vector<1x1x128xf32> to vector<1x128xf32>
    %35 = vector.broadcast %34 : vector<1x128xf32> to vector<16x128xf32>
    %36 = arith.addf %32, %35 : vector<16x128xf32>
    %cst_29 = arith.constant 0.000000e+00 : f32
    %37 = vector.broadcast %cst_29 : f32 to vector<16x128xf32>
    %38 = arith.maximumf %36, %37 : vector<16x128xf32>
    %39 = arith.truncf %38 : vector<16x128xf32> to vector<16x128xbf16>
    %c0_30 = arith.constant 0 : index
    %c0_31 = arith.constant 0 : index
    %c0_32 = arith.constant 0 : index
    %40 = vector.load %arg7[%c0_30, %c0_31, %c0_32] : memref<1x128x128xbf16, #tpu.memory_space<vmem>>, vector<1x128x128xbf16>
    %41 = vector.shape_cast %40 : vector<1x128x128xbf16> to vector<128x128xbf16>
    %cst_33 = arith.constant dense<0.000000e+00> : vector<16x128xf32>
    %42 = tpu.matmul %39, %41, %cst_33 {dimension_numbers = #tpu.dot_dimension_numbers<[1], [0], [0], [1], [0, 0, 1, 1], [], []>} : vector<16x128xbf16>, vector<128x128xbf16>, vector<16x128xf32> -> vector<16x128xf32>
    %c0_34 = arith.constant 0 : index
    %c0_35 = arith.constant 0 : index
    %c0_36 = arith.constant 0 : index
    %43 = vector.load %arg8[%c0_34, %c0_35, %c0_36] : memref<1x1x128xf32, #tpu.memory_space<vmem>>, vector<1x1x128xf32>
    %44 = vector.shape_cast %43 : vector<1x1x128xf32> to vector<1x128xf32>
    %45 = vector.broadcast %44 : vector<1x128xf32> to vector<16x128xf32>
    %46 = arith.addf %42, %45 : vector<16x128xf32>
    %c0_37 = arith.constant 0 : index
    %c0_38 = arith.constant 0 : index
    %c0_39 = arith.constant 0 : index
    %47 = vector.load %arg9[%c0_37, %c0_38, %c0_39] : memref<1x16x128xf32, #tpu.memory_space<vmem>>, vector<1x16x128xf32>
    %48 = vector.shape_cast %47 : vector<1x16x128xf32> to vector<16x128xf32>
    %49 = vector.shape_cast %46 : vector<16x128xf32> to vector<1x16x128xf32>
    tpu.vector_store %arg9[%c0_37, %c0_38, %c0_39], %49 {strides = array<i32>} : memref<1x16x128xf32, #tpu.memory_space<vmem>>, vector<1x16x128xf32>,
    return
  }
  func.func @transform_0(%arg0: i32, %arg1: i32) -> (i32, i32, i32) {
    %c0_i32 = arith.constant 0 : i32
    %c0_i32_0 = arith.constant 0 : i32
    return %arg0, %arg1, %c0_i32 : i32, i32, i32
  }
  func.func @transform_1(%arg0: i32, %arg1: i32) -> (i32, i32, i32) {
    %c0_i32 = arith.constant 0 : i32
    %c0_i32_0 = arith.constant 0 : i32
    %c0_i32_1 = arith.constant 0 : i32
    return %arg0, %c0_i32, %c0_i32_0 : i32, i32, i32
  }
  func.func @transform_2(%arg0: i32, %arg1: i32) -> (i32, i32, i32) {
    %c0_i32 = arith.constant 0 : i32
    %c0_i32_0 = arith.constant 0 : i32
    %c0_i32_1 = arith.constant 0 : i32
    return %arg0, %c0_i32, %c0_i32_0 : i32, i32, i32
  }
  func.func @transform_3(%arg0: i32, %arg1: i32) -> (i32, i32, i32) {
    %c0_i32 = arith.constant 0 : i32
    %c0_i32_0 = arith.constant 0 : i32
    %c0_i32_1 = arith.constant 0 : i32
    %c0_i32_2 = arith.constant 0 : i32
    return %c0_i32, %c0_i32_0, %c0_i32_1 : i32, i32, i32
  }
  func.func @transform_4(%arg0: i32, %arg1: i32) -> (i32, i32, i32) {
    %c0_i32 = arith.constant 0 : i32
    %c0_i32_0 = arith.constant 0 : i32
    %c0_i32_1 = arith.constant 0 : i32
    %c0_i32_2 = arith.constant 0 : i32
    return %c0_i32, %c0_i32_0, %c0_i32_1 : i32, i32, i32
  }
  func.func @transform_5(%arg0: i32, %arg1: i32) -> (i32, i32, i32) {
    %c0_i32 = arith.constant 0 : i32
    %c0_i32_0 = arith.constant 0 : i32
    %c0_i32_1 = arith.constant 0 : i32
    return %arg0, %c0_i32, %c0_i32_0 : i32, i32, i32
  }
  func.func @transform_6(%arg0: i32, %arg1: i32) -> (i32, i32, i32) {
    %c0_i32 = arith.constant 0 : i32
    %c0_i32_0 = arith.constant 0 : i32
    %c0_i32_1 = arith.constant 0 : i32
    return %arg0, %c0_i32, %c0_i32_0 : i32, i32, i32
  }
  func.func @transform_7(%arg0: i32, %arg1: i32) -> (i32, i32, i32) {
    %c0_i32 = arith.constant 0 : i32
    %c0_i32_0 = arith.constant 0 : i32
    return %arg0, %arg1, %c0_i32 : i32, i32, i32
  }
}

module attributes {stable_mosaic.version = 11 : i64} {
  func.func @_fused_translator_kernel(%arg0: i32, %arg1: i32, %arg2: memref<1x16x128xbf16, #tpu.memory_space<vmem>>, %arg3: memref<1x128x128xbf16, #tpu.memory_space<vmem>>, %arg4: memref<1x1x128xf32, #tpu.memory_space<vmem>>, %arg5: memref<3x128x128xbf16, #tpu.memory_space<vmem>>, %arg6: memref<3x1x128xf32, #tpu.memory_space<vmem>>, %arg7: memref<1x128x128xbf16, #tpu.memory_space<vmem>>, %arg8: memref<1x1x128xf32, #tpu.memory_space<vmem>>, %arg9: memref<1x16x128xf32, #tpu.memory_space<vmem>>) attributes {dimension_semantics = [#tpu.dimension_semantics<parallel>, #tpu.dimension_semantics<parallel>], iteration_bounds = array<i64: 2, 1>, scalar_prefetch = 0 : i64, scratch_operands = 0 : i64, tpu.core_type = #tpu.core_type<tc>, window_params = [{transform_indices = @transform_0, window_bounds = array<i64: 1, 16, 128>}, {transform_indices = @transform_1, window_bounds = array<i64: 1, 128, 128>}, {transform_indices = @transform_2, window_bounds = array<i64: 1, 1, 128>}, {pipeline_mode = #tpu.pipeline_mode<synchronous>, transform_indices = @transform_3, window_bounds = array<i64: 3, 128, 128>}, {pipeline_mode = #tpu.pipeline_mode<synchronous>, transform_indices = @transform_4, window_bounds = array<i64: 3, 1, 128>}, {transform_indices = @transform_5, window_bounds = array<i64: 1, 128, 128>}, {transform_indices = @transform_6, window_bounds = array<i64: 1, 1, 128>}, {transform_indices = @transform_7, window_bounds = array<i64: 1, 16, 128>}]} {
    %c0 = arith.constant 0 : index
    %c0_0 = arith.constant 0 : index
    %c0_1 = arith.constant 0 : index
    %0 = vector.load %arg2[%c0, %c0_0, %c0_1] : memref<1x16x128xbf16, #tpu.memory_space<vmem>>, vector<1x16x128xbf16>
    %1 = vector.shape_cast %0 : vector<1x16x128xbf16> to vector<16x128xbf16>
    %c0_2 = arith.constant 0 : index
    %c0_3 = arith.constant 0 : index
    %c0_4 = arith.constant 0 : index
    %2 = vector.load %arg3[%c0_2, %c0_3, %c0_4] : memref<1x128x128xbf16, #tpu.memory_space<vmem>>, vector<1x128x128xbf16>
    %3 = vector.shape_cast %2 : vector<1x128x128xbf16> to vector<128x128xbf16>
    %cst = arith.constant dense<0.000000e+00> : vector<16x128xf32>
    %4 = tpu.matmul %1, %3, %cst {dimension_numbers = #tpu.dot_dimension_numbers<[1], [0], [0], [1], [0, 0, 1, 1], [], []>} : vector<16x128xbf16>, vector<128x128xbf16>, vector<16x128xf32> -> vector<16x128xf32>
    %c0_5 = arith.constant 0 : index
    %c0_6 = arith.constant 0 : index
    %c0_7 = arith.constant 0 : index
    %5 = vector.load %arg4[%c0_5, %c0_6, %c0_7] : memref<1x1x128xf32, #tpu.memory_space<vmem>>, vector<1x1x128xf32>
    %6 = vector.shape_cast %5 : vector<1x1x128xf32> to vector<1x128xf32>
    %7 = vector.broadcast %6 : vector<1x128xf32> to vector<16x128xf32>
    %8 = arith.addf %4, %7 : vector<16x128xf32>
    %9 = arith.truncf %8 : vector<16x128xf32> to vector<16x128xbf16>
    %c0_8 = arith.constant 0 : index
    %c0_9 = arith.constant 0 : index
    %c0_10 = arith.constant 0 : index
    %10 = vector.load %arg5[%c0_8, %c0_9, %c0_10] : memref<3x128x128xbf16, #tpu.memory_space<vmem>>, vector<1x128x128xbf16>
    %11 = vector.shape_cast %10 : vector<1x128x128xbf16> to vector<128x128xbf16>
    %cst_11 = arith.constant dense<0.000000e+00> : vector<16x128xf32>
    %12 = tpu.matmul %9, %11, %cst_11 {dimension_numbers = #tpu.dot_dimension_numbers<[1], [0], [0], [1], [0, 0, 1, 1], [], []>} : vector<16x128xbf16>, vector<128x128xbf16>, vector<16x128xf32> -> vector<16x128xf32>
    %c0_12 = arith.constant 0 : index
    %c0_13 = arith.constant 0 : index
    %c0_14 = arith.constant 0 : index
    %13 = vector.load %arg6[%c0_12, %c0_13, %c0_14] : memref<3x1x128xf32, #tpu.memory_space<vmem>>, vector<1x1x128xf32>
    %14 = vector.shape_cast %13 : vector<1x1x128xf32> to vector<1x128xf32>
    %15 = vector.broadcast %14 : vector<1x128xf32> to vector<16x128xf32>
    %16 = arith.addf %12, %15 : vector<16x128xf32>
    %cst_15 = arith.constant 0.000000e+00 : f32
    %17 = vector.broadcast %cst_15 : f32 to vector<16x128xf32>
    %18 = arith.maximumf %16, %17 : vector<16x128xf32>
    %19 = arith.truncf %18 : vector<16x128xf32> to vector<16x128xbf16>
    %c1 = arith.constant 1 : index
    %c0_16 = arith.constant 0 : index
    %c0_17 = arith.constant 0 : index
    %20 = vector.load %arg5[%c1, %c0_16, %c0_17] : memref<3x128x128xbf16, #tpu.memory_space<vmem>>, vector<1x128x128xbf16>
    %21 = vector.shape_cast %20 : vector<1x128x128xbf16> to vector<128x128xbf16>
    %cst_18 = arith.constant dense<0.000000e+00> : vector<16x128xf32>
    %22 = tpu.matmul %19, %21, %cst_18 {dimension_numbers = #tpu.dot_dimension_numbers<[1], [0], [0], [1], [0, 0, 1, 1], [], []>} : vector<16x128xbf16>, vector<128x128xbf16>, vector<16x128xf32> -> vector<16x128xf32>
    %c1_19 = arith.constant 1 : index
    %c0_20 = arith.constant 0 : index
    %c0_21 = arith.constant 0 : index
    %23 = vector.load %arg6[%c1_19, %c0_20, %c0_21] : memref<3x1x128xf32, #tpu.memory_space<vmem>>, vector<1x1x128xf32>
    %24 = vector.shape_cast %23 : vector<1x1x128xf32> to vector<1x128xf32>
    %25 = vector.broadcast %24 : vector<1x128xf32> to vector<16x128xf32>
    %26 = arith.addf %22, %25 : vector<16x128xf32>
    %cst_22 = arith.constant 0.000000e+00 : f32
    %27 = vector.broadcast %cst_22 : f32 to vector<16x128xf32>
    %28 = arith.maximumf %26, %27 : vector<16x128xf32>
    %29 = arith.truncf %28 : vector<16x128xf32> to vector<16x128xbf16>
    %c2 = arith.constant 2 : index
    %c0_23 = arith.constant 0 : index
    %c0_24 = arith.constant 0 : index
    %30 = vector.load %arg5[%c2, %c0_23, %c0_24] : memref<3x128x128xbf16, #tpu.memory_space<vmem>>, vector<1x128x128xbf16>
    %31 = vector.shape_cast %30 : vector<1x128x128xbf16> to vector<128x128xbf16>
    %cst_25 = arith.constant dense<0.000000e+00> : vector<16x128xf32>
    %32 = tpu.matmul %29, %31, %cst_25 {dimension_numbers = #tpu.dot_dimension_numbers<[1], [0], [0], [1], [0, 0, 1, 1], [], []>} : vector<16x128xbf16>, vector<128x128xbf16>, vector<16x128xf32> -> vector<16x128xf32>
    %c2_26 = arith.constant 2 : index
    %c0_27 = arith.constant 0 : index
    %c0_28 = arith.constant 0 : index
    %33 = vector.load %arg6[%c2_26, %c0_27, %c0_28] : memref<3x1x128xf32, #tpu.memory_space<vmem>>, vector<1x1x128xf32>
    %34 = vector.shape_cast %33 : vector<1x1x128xf32> to vector<1x128xf32>
    %35 = vector.broadcast %34 : vector<1x128xf32> to vector<16x128xf32>
    %36 = arith.addf %32, %35 : vector<16x128xf32>
    %cst_29 = arith.constant 0.000000e+00 : f32
    %37 = vector.broadcast %cst_29 : f32 to vector<16x128xf32>
    %38 = arith.maximumf %36, %37 : vector<16x128xf32>
    %39 = arith.truncf %38 : vector<16x128xf32> to vector<16x128xbf16>
    %c0_30 = arith.constant 0 : index
    %c0_31 = arith.constant 0 : index
    %c0_32 = arith.constant 0 : index
    %40 = vector.load %arg7[%c0_30, %c0_31, %c0_32] : memref<1x128x128xbf16, #tpu.memory_space<vmem>>, vector<1x128x128xbf16>
    %41 = vector.shape_cast %40 : vector<1x128x128xbf16> to vector<128x128xbf16>
    %cst_33 = arith.constant dense<0.000000e+00> : vector<16x128xf32>
    %42 = tpu.matmul %39, %41, %cst_33 {dimension_numbers = #tpu.dot_dimension_numbers<[1], [0], [0], [1], [0, 0, 1, 1], [], []>} : vector<16x128xbf16>, vector<128x128xbf16>, vector<16x128xf32> -> vector<16x128xf32>
    %c0_34 = arith.constant 0 : index
    %c0_35 = arith.constant 0 : index
    %c0_36 = arith.constant 0 : index
    %43 = vector.load %arg8[%c0_34, %c0_35, %c0_36] : memref<1x1x128xf32, #tpu.memory_space<vmem>>, vector<1x1x128xf32>
    %44 = vector.shape_cast %43 : vector<1x1x128xf32> to vector<1x128xf32>
    %45 = vector.broadcast %44 : vector<1x128xf32> to vector<16x128xf32>
    %46 = arith.addf %42, %45 : vector<16x128xf32>
    %c0_37 = arith.constant 0 : index
    %c0_38 = arith.constant 0 : index
    %c0_39 = arith.constant 0 : index
    %47 = vector.load %arg9[%c0_37, %c0_38, %c0_39] : memref<1x16x128xf32, #tpu.memory_space<vmem>>, vector<1x16x128xf32>
    %48 = vector.shape_cast %47 : vector<1x16x128xf32> to vector<16x128xf32>
    %49 = vector.shape_cast %46 : vector<16x128xf32> to vector<1x16x128xf32>
    tpu.vector_store %arg9[%c0_37, %c0_38, %c0_39], %49 {strides = array<i32>} : memref<1x16x128xf32, #tpu.memory_space<vmem>>, vector<1x16x128xf32>,
    return
  }
  func.func @transform_0(%arg0: i32, %arg1: i32) -> (i32, i32, i32) {
    %c0_i32 = arith.constant 0 : i32
    %c0_i32_0 = arith.constant 0 : i32
    return %arg0, %arg1, %c0_i32 : i32, i32, i32
  }
  func.func @transform_1(%arg0: i32, %arg1: i32) -> (i32, i32, i32) {
    %c0_i32 = arith.constant 0 : i32
    %c0_i32_0 = arith.constant 0 : i32
    %c0_i32_1 = arith.constant 0 : i32
    return %arg0, %c0_i32, %c0_i32_0 : i32, i32, i32
  }
  func.func @transform_2(%arg0: i32, %arg1: i32) -> (i32, i32, i32) {
    %c0_i32 = arith.constant 0 : i32
    %c0_i32_0 = arith.constant 0 : i32
    %c0_i32_1 = arith.constant 0 : i32
    return %arg0, %c0_i32, %c0_i32_0 : i32, i32, i32
  }
  func.func @transform_3(%arg0: i32, %arg1: i32) -> (i32, i32, i32) {
    %c0_i32 = arith.constant 0 : i32
    %c0_i32_0 = arith.constant 0 : i32
    %c0_i32_1 = arith.constant 0 : i32
    %c0_i32_2 = arith.constant 0 : i32
    return %c0_i32, %c0_i32_0, %c0_i32_1 : i32, i32, i32
  }
  func.func @transform_4(%arg0: i32, %arg1: i32) -> (i32, i32, i32) {
    %c0_i32 = arith.constant 0 : i32
    %c0_i32_0 = arith.constant 0 : i32
    %c0_i32_1 = arith.constant 0 : i32
    %c0_i32_2 = arith.constant 0 : i32
    return %c0_i32, %c0_i32_0, %c0_i32_1 : i32, i32, i32
  }
  func.func @transform_5(%arg0: i32, %arg1: i32) -> (i32, i32, i32) {
    %c0_i32 = arith.constant 0 : i32
    %c0_i32_0 = arith.constant 0 : i32
    %c0_i32_1 = arith.constant 0 : i32
    return %arg0, %c0_i32, %c0_i32_0 : i32, i32, i32
  }
  func.func @transform_6(%arg0: i32, %arg1: i32) -> (i32, i32, i32) {
    %c0_i32 = arith.constant 0 : i32
    %c0_i32_0 = arith.constant 0 : i32
    %c0_i32_1 = arith.constant 0 : i32
    return %arg0, %c0_i32, %c0_i32_0 : i32, i32, i32
  }
  func.func @transform_7(%arg0: i32, %arg1: i32) -> (i32, i32, i32) {
    %c0_i32 = arith.constant 0 : i32
    %c0_i32_0 = arith.constant 0 : i32
    return %arg0, %arg1, %c0_i32 : i32, i32, i32
  }
}

</mosaic_0001>

<bundles_post_ra>
// kernel: tpu_custom_call.1
= control target key start
LH: loop header
LB: loop body
LE: loop exit
PB: predicated region body
PF: predicated region fallthrough
CT: control target
= control target key end

     0   :  { %s2139_s0 = inlined_call_operand.hbm [shape: bf16[2,16,128], index: 0, kind: input, shape index: {}]   ;;  %s2140_s1 = inlined_call_operand.hbm [shape: bf16[2,128,128], index: 1, kind: input, shape index: {}]   ;;  %s2141_s2 = inlined_call_operand.vmem [shape: f32[2,1,128], index: 2, kind: input, shape index: {}]   ;;  %s2142_s3 = inlined_call_operand.hbm [shape: bf16[3,128,128], index: 3, kind: input, shape index: {}]   ;;  %s2143_s4 = inlined_call_operand.vmem [shape: f32[3,1,128], index: 4, kind: input, shape index: {}]   ;;  %s2144_s5 = inlined_call_operand.hbm [shape: bf16[2,128,128], index: 5, kind: input, shape index: {}]   ;;  %s2145_s6 = inlined_call_operand.vmem [shape: f32[2,1,128], index: 6, kind: input, shape index: {}]   ;;  %s2146_s7 = inlined_call_operand.hbm [shape: f32[2,16,128], index: 7, kind: output, shape index: {}]  }
   0x1   :  { %2159 = sst [smem:[#allocation18_spill]] %s2140_s1 }
   0x2   :  { %12 = vsyncpa [#allocation3], 0 }
   0x3   :  { %14 = vsyncpa [#allocation3 + $0x1], 0 }
   0x4   :  { %15 = vsyncpa [#allocation6], 0 }
   0x5   :  { %16 = vsyncpa [#allocation9], 0 }
   0x6   :  { %17 = vsyncpa [#allocation4], 0 }
   0x7   :  { %19 = vsyncpa [#allocation4 + $0x1], 0  ;;  %s1765_s24 = smov 0   ;;  %s1767_s25 = smov 0  }
   0x8   :  { %s1769_s26 = smov 0   ;;  %s1771_s27 = smov 0  }
   0x9   :  { %s1773_s28 = smov 0   ;;  %s1775_s29 = smov 0  }
   0xa LB: > { %2160 = sst [smem:[#allocation16_spill]] %s1692_s24  ;;  %s1150_s30 = sadd.s32 4294967295, %s1712_s29   ;;  %s1712_s29 = sphi %s1775_s29, %s25_s29   ;;  %s1708_s28 = sphi %s1773_s28, %s2190_s28   ;;  %s1704_s27 = sphi %s1771_s27, %s2189_s27   ;;  %s1700_s26 = sphi %s1769_s26, %s2188_s26   ;;  %s1696_s25 = sphi %s1767_s25, %s2187_s25   ;;  %s1692_s24 = sphi %s1765_s24, %s2186_s24  }
   0xb   : > { %s1151_s8 = sadd.s32 4294967294, %s1712_s29   ;;  %p59_p0 = scmp.ne.s32.totalorder %s1696_s25, %s1692_s24 }
   0xc   : > { %p1799_p1 = scmp.eq.s32.totalorder %s1150_s30, 0  ;;  %p1803_p2 = scmp.eq.s32.totalorder %s1150_s30, 1 }
   0xd   : > { %p237_p3 = scmp.eq.s32.totalorder %s1151_s8, 1  ;;  %p1152_p5 = scmp.ge.s32.totalorder %s1712_s29, 1 }
   0xe   : > { %s2161_s9 = scalar_select %p1799_p1, 1, 0 }
   0xf   : > { %s2162_s10 = scalar_select %p1803_p2, 1, 0 }
  0x10   : > { %p1809_p4 = por %p1799_p1, %p59_p0  ;;  %p1814_p6 = por %p237_p3, %p59_p0 }
  0x11   : > { %p244_p7 = scmp.lt.s32.totalorder %s1712_s29, 3  ;;  %s2147_s13 = sshll.u32 %s1704_s27, 10 }
  0x12   : > { %s2163_s11 = scalar_select %p1809_p4, 1, 0 }
  0x13   : > { %s2164_s12 = scalar_select %p1814_p6, 1, 0 }
  0x14   : > { %p1820_p8 = pnand %p1152_p5, %p244_p7  ;;  %s2167_s1 = sld [smem:[#allocation18_spill]] }
  0x15   : > { %2165 = sst [smem:[#allocation17_spill]] %s2164_s12  ;;  %s1714_s18 = smov [#allocation5]  }
  0x16   : > { %s2166_s14 = scalar_select %p1820_p8, 1, 0 }
  0x17   : > { %s259_s19 = sshll.u32 %s1714_s18, 4  ;;  %p1380_p9 = pneg %p1820_p8  ;;  %s1833_s19 = int_to_ptr.vmem [resolvable:$true] %s259_s19 }
  0x18   : > { %s1715_s22 = smov [#allocation7]  }
  0x19   : > { %p1837_p10 = pnand %p1380_p9, %p1809_p4  ;;  %p1844_p12 = pnand %p1380_p9, %p1799_p1 }
  0x1a   : > { %s1829_s17 = scalar_lea.hbm %s2167_s1, %s2147_s13  ;;  %s1848_s23 = sshll.u32 %s1715_s22, 4  ;;  %s279_s23 = int_to_ptr.vmem [resolvable:$true] %s1848_s23 }
  0x1b   : > { %s2168_s20 = scalar_select %p1837_p10, 1, 0 }
  0x1c   : > { %s2169_s21 = scalar_select %p1844_p12, 1, 0 }
  0x1d   : > { %s1500_s30 = scalar_lea.hbm %s1829_s17, 1024  ;;  %p2155_p0 = pneg %p1837_p10 }
  0x1e   : > { %p1501_p13 = scmp.ne.s32.totalorder %s1829_s17, %s1500_s30  ;;  %s1505_s16 = scalar_lea.hbm %s2167_s1, 2048 }
  0x1f   : > { %p1506_p7 = scmp.lt.u32.totalorder %s1829_s17, %s2167_s1  ;;  %p1507_p9 = scmp.lt.u32.totalorder %s1505_s16, %s1500_s30 }
  0x20   : > { %p1503_p3 = pnand %p2155_p0, %p1501_p13  ;;  %p1509_p6 = scmp.lt.u32.totalorder %s1500_s30, %s1829_s17 }
  0x21   : > { %p1508_p11 = por %p1507_p9, %p1506_p7 }
  0x22   : > { %p1504_p5 = pneg %p1503_p3 }
  0x23   : > { %p1510_p1 = por %p1509_p6, %p1508_p11 }
  0x25   : > { %p1511_p4 = pnand %p1510_p1, %p1504_p5 }
  0x27   : > { %1514 = shalt.err (!%p1511_p4)
}
  0x28   : > { %s1515_s22 = scalar_lea.vmem %s1833_s19, 1024  ;;  %p1523_p2 = scmp.lt.s32.totalorder %s1833_s19, %s1833_s19 }
  0x29   : > { %p1516_p13 = scmp.ne.s32.totalorder %s1833_s19, %s1515_s22  ;;  %p1524_p12 = scmp.lt.s32.totalorder %s1515_s22, %s1515_s22 }
  0x2b   : > { %p1518_p3 = pnand %p1516_p13, %p2155_p0  ;;  %p1525_p7 = por %p1524_p12, %p1523_p2 }
  0x2d   : > { %p1519_p8 = pneg %p1518_p3 }
  0x2f   : > { %p1526_p9 = pnand %p1525_p7, %p1519_p8 }
  0x31   : > { %1529 = shalt.err (!%p1526_p9)
}
  0x32   : > { %s1716_s13 = smov 64   ;;  %s1717_s30 = smov 4  }
  0x33   : > { %1383 = dma.hbm_to_vmem [thread:$0]  (!%p1837_p10), %s1829_s17, 1024, %s1833_s19, [#allocation6], %s1716_s13, %s1716_s13, %s1717_s30  }
  0x34   : > { %s1530_s16 = scalar_lea.hbm %s2142_s3, 3072  ;;  %p2170_p2 = scmp.ne.s32.totalorder %s2169_s21, 0 }
  0x35   : > { %p1531_p1 = scmp.ne.s32.totalorder %s2142_s3, %s1530_s16  ;;  %p1537_p11 = scmp.lt.u32.totalorder %s1530_s16, %s2142_s3 }
  0x36   : > { %p1532_p4 = pneg %p2170_p2 }
  0x38   : > { %p1533_p6 = pnand %p1532_p4, %p1531_p1 }
  0x3a   : > { %p1534_p8 = pneg %p1533_p6 }
  0x3c   : > { %p1539_p12 = pnand %p1537_p11, %p1534_p8 }
  0x3e   : > { %1542 = shalt.err (!%p1539_p12)
}
  0x3f   : > { %s1543_s17 = scalar_lea.vmem %s279_s23, 3072  ;;  %p1551_p7 = scmp.lt.s32.totalorder %s279_s23, %s279_s23 }
  0x40   : > { %p1544_p5 = scmp.ne.s32.totalorder %s279_s23, %s1543_s17  ;;  %p1552_p9 = scmp.lt.s32.totalorder %s1543_s17, %s1543_s17 }
  0x42   : > { %p1546_p13 = pnand %p1544_p5, %p1532_p4  ;;  %p1553_p0 = por %p1552_p9, %p1551_p7 }
  0x44   : > { %p1547_p3 = pneg %p1546_p13 }
  0x46   : > { %p1554_p10 = pnand %p1553_p0, %p1547_p3 }
  0x48   : > { %1557 = shalt.err (!%p1554_p10)
}
  0x49   : > { %1386 = dma.hbm_to_vmem [thread:$0]  (!%p2170_p2), %s2142_s3, 3072, %s279_s23, [#allocation6], %s1716_s13, %s1716_s13, %s1717_s30  }
  0x4a   : > { %s2171_s1 = sshll.u32 %s1704_s27, 10  ;;  %s1718_s18 = smov [#allocation8]  }
  0x4b   : > { %s296_s16 = scalar_lea.hbm %s2144_s5, %s2171_s1  ;;  %s297_s22 = sshll.u32 %s1718_s18, 4  ;;  %s298_s22 = int_to_ptr.vmem [resolvable:$true] %s297_s22 }
  0x4c   : > { %s1558_s17 = scalar_lea.hbm %s296_s16, 1024  ;;  %p2172_p0 = scmp.ne.s32.totalorder %s2168_s20, 0 }
  0x4d   : > { %p1559_p10 = scmp.ne.s32.totalorder %s296_s16, %s1558_s17  ;;  %s1563_s19 = scalar_lea.hbm %s2144_s5, 2048 }
  0x4e   : > { %p2173_p1 = pneg %p2172_p0  ;;  %p1564_p2 = scmp.lt.u32.totalorder %s296_s16, %s2144_s5 }
  0x4f   : > { %p1565_p8 = scmp.lt.u32.totalorder %s1563_s19, %s1558_s17  ;;  %p1567_p12 = scmp.lt.u32.totalorder %s1558_s17, %s296_s16 }
  0x50   : > { %p1561_p4 = pnand %p1559_p10, %p2173_p1 }
  0x51   : > { %p1566_p11 = por %p1565_p8, %p1564_p2 }
  0x52   : > { %p1562_p6 = pneg %p1561_p4 }
  0x53   : > { %p1568_p5 = por %p1567_p12, %p1566_p11 }
  0x55   : > { %p1569_p13 = pnand %p1568_p5, %p1562_p6 }
  0x57   : > { %1572 = shalt.err (!%p1569_p13)
}
  0x58   : > { %s1573_s1 = scalar_lea.vmem %s298_s22, 1024  ;;  %p2174_p7 = pmov %p2173_p1 }
  0x59   : > { %p1574_p3 = scmp.ne.s32.totalorder %s298_s22, %s1573_s1  ;;  %p1581_p1 = scmp.lt.s32.totalorder %s298_s22, %s298_s22 }
  0x5a   : > { %p1582_p4 = scmp.lt.s32.totalorder %s1573_s1, %s1573_s1 }
  0x5b   : > { %p1576_p9 = pnand %p1574_p3, %p2174_p7 }
  0x5c   : > { %p1583_p2 = por %p1582_p4, %p1581_p1 }
  0x5d   : > { %p1577_p10 = pneg %p1576_p9 }
  0x5f   : > { %p1584_p8 = pnand %p1583_p2, %p1577_p10 }
  0x61   : > { %1587 = shalt.err (!%p1584_p8)
}
  0x62   : > { %1389 = dma.hbm_to_vmem [thread:$0]  (!%p2172_p0), %s296_s16, 1024, %s298_s22, [#allocation9], %s1716_s13, %s1716_s13, %s1717_s30  }
  0x63   : > { %s37_s24 = sadd.s32 1, %s1708_s28  ;;  %s46_s12 = sadd.s32 1, %s1700_s26 }
  0x64   : > { %p39_p6 = scmp.ge.s32.totalorder %s37_s24, 2  ;;  %p53_p11 = scmp.ne.s32.totalorder %s1700_s26, %s1696_s25 }
  0x65   : > { %p54_p12 = scmp.eq.s32.totalorder %s1712_s29, 0  ;;  %p1399_p5 = scmp.lt.s32.totalorder %s1712_s29, 2 }
  0x66   : > { %s2192_s24 = smov (%p39_p6, %s37_s24), 0  ;;  %p2175_p3 = scmp.ne.s32.totalorder %s2162_s10, 0 }
  0x67   : > { %p55_p13 = por %p54_p12, %p53_p11  ;;  %s41_s15 = ssub.s32 %s1708_s28, %s2192_s24 }
  0x68   : > { %p1931_p7 = por %p2175_p3, %p53_p11  ;;  %s317_s18 = sand.u32 1, %s1700_s26  }
  0x69   : > { %p44_p9 = scmp.eq.s32.totalorder %s41_s15, 0  ;;  %s1159_s16 = sshll.u32 %s317_s18, 3 }
  0x6a   : > { %s1221_s22 = sshll.u32 %s1708_s28, 7  ;;  %s321_s10 = scalar_lea.vmem [#allocation2], %s1159_s16 }
  0x6b   : > { %s1940_s17 = scalar_select %p44_p9, %s1700_s26, %s46_s12  }
  0x6c   : > { %s1945_s8 = scalar_lea.hbm %s2139_s0, %s1221_s22  ;;  %s330_s23 = sshll.u32 %s321_s10, 4  ;;  %s1953_s23 = int_to_ptr.vmem [resolvable:$true] %s330_s23 }
  0x6d   : > { %p1949_p0 = pnand %p1399_p5, %p55_p13  ;;  %s1955_s12 = scalar_lea.sflag [#allocation3], %s317_s18 }
  0x6e   : > { %s1588_s15 = scalar_lea.hbm %s1945_s8, 128  ;;  %s1593_s21 = scalar_lea.hbm %s2139_s0, 256 }
  0x6f   : > { %p1589_p10 = scmp.ne.s32.totalorder %s1945_s8, %s1588_s15  ;;  %p1590_p1 = pneg %p1949_p0 }
  0x70   : > { %p1594_p8 = scmp.lt.u32.totalorder %s1945_s8, %s2139_s0  ;;  %p1595_p6 = scmp.lt.u32.totalorder %s1593_s21, %s1588_s15 }
  0x71   : > { %p1591_p4 = pnand %p1590_p1, %p1589_p10  ;;  %p1597_p12 = scmp.lt.u32.totalorder %s1588_s15, %s1945_s8 }
  0x72   : > { %p1596_p11 = por %p1595_p6, %p1594_p8 }
  0x73   : > { %p1592_p2 = pneg %p1591_p4 }
  0x74   : > { %p1598_p5 = por %p1597_p12, %p1596_p11 }
  0x76   : > { %p1599_p13 = pnand %p1598_p5, %p1592_p2 }
  0x78   : > { %1602 = shalt.err (!%p1599_p13)
}
  0x79   : > { %s1603_s18 = scalar_lea.vmem %s1953_s23, 128  ;;  %s1719_s16 = smov [#allocation2]  }
  0x7a   : > { %p1604_p3 = scmp.ne.s32.totalorder %s1953_s23, %s1603_s18  ;;  %s1608_s22 = sshll.u32 %s1719_s16, 4  ;;  %s1609_s22 = int_to_ptr.vmem [resolvable:$false] %s1608_s22 }
  0x7b   : > { %s1610_s19 = scalar_lea.vmem %s1609_s22, 256  ;;  %p1611_p4 = scmp.lt.s32.totalorder %s1953_s23, %s1609_s22 }
  0x7c   : > { %p1606_p9 = pnand %p1604_p3, %p1590_p1  ;;  %p1612_p8 = scmp.lt.s32.totalorder %s1610_s19, %s1603_s18 }
  0x7e   : > { %p1607_p10 = pneg %p1606_p9  ;;  %p1613_p6 = por %p1612_p8, %p1611_p4 }
  0x80   : > { %p1614_p11 = pnand %p1613_p6, %p1607_p10 }
  0x82   : > { %1617 = shalt.err (!%p1614_p11)
}
  0x83   : > { %1393 = dma.hbm_to_vmem [thread:$0]  (!%p1949_p0), %s1945_s8, 128, %s1953_s23, %s1955_s12, %s1716_s13, %s1716_s13, %s1717_s30  }
  0x84   : > { %p2178_p1 = scmp.ne.s32.totalorder %s2166_s14, 0 }
  0x85   : > { %s1989_s15 = sand.u32 (!%p2178_p1), 1, %s1696_s25   ;;  %p2179_p2 = scmp.ne.s32.totalorder (!%p2178_p1), %s2163_s11, 0 }
  0x86   : > { %342 = sbr.rel (%p2178_p1) target bundleno = 1292 (0x50c), region = 48  ;;  %s1163_s21 = sshll.u32 (!%p2178_p1), %s1989_s15, 3 }
  0x87   : > { %s345_s10 = scalar_lea.sflag (!%p2178_p1), [#allocation3], %s1989_s15  ;;  %s1993_s18 = scalar_lea.vmem (!%p2178_p1), [#allocation2], %s1163_s21 }
  0x8d   : > { %1671 = dma.done.wait (%p2179_p2), %s345_s10, 128  }
  0x8e   : > { %1673 = vsyncadd (%p2179_p2), %s345_s10, 4294967168 }
  0x8f   : > { %1675 = dma.done.wait (%p2179_p2), [#allocation6], 1024  }
  0x90   : > { %1677 = vsyncadd (%p2179_p2), [#allocation6], 4294966272  ;;  %p2180_p0 = scmp.ne.s32.totalorder %s2161_s9, 0 }
  0x92   : > { %1679 = dma.done.wait (%p2180_p0), [#allocation6], 3072  }
  0x93   : > { %1681 = vsyncadd (%p2180_p0), [#allocation6], 4294964224 }
  0x94   : > { %1683 = dma.done.wait (%p2179_p2), [#allocation9], 1024  }
  0x95   : > { %1685 = vsyncadd (%p2179_p2), [#allocation9], 4294966272  ;;  %v1720_v0 = vmov 0.0   ;;  %vm1721_vm0 = vmmov 0   ;;  %v1459_v1 = vld [vmem:[#allocation5] sm:$0xff]   ;;  %v1460_v2 = vld [vmem:[#allocation5 + $0x8] sm:$0xff]  }
  0x96   : > { %1268 = vmatprep.subr.bf16.mxu0 %v1720_v0  ;;  %1284 = vmatprep.mubr.msk.bf16.mxu0 %vm1721_vm0, %v1720_v0  ;;  %v1461_v3 = vld [vmem:[#allocation5 + $0x10] sm:$0xff]   ;;  %v1468_v4 = vld [vmem:[#allocation7] sm:$0xff]   ;;  %v1462_v5 = vld [vmem:[#allocation5 + $0x18] sm:$0xff]   ;;  %p398_p12 = scmp.lt.s32.totalorder %s1704_s27, 1  ;;  %s1165_s22 = sshll.u32 %s1989_s15, 4 }
  0x97   : > { %1288 = vmatprep.subr.bf16.mxu1 %v1720_v0  ;;  %1304 = vmatprep.mubr.msk.bf16.mxu1 %vm1721_vm0, %v1720_v0  ;;  %v1469_v6 = vld [vmem:[#allocation7 + $0x8] sm:$0xff]   ;;  %v1463_v7 = vld [vmem:[#allocation5 + $0x20] sm:$0xff]   ;;  %v1470_v8 = vld [vmem:[#allocation7 + $0x10] sm:$0xff]   ;;  %s1222_s14 = sshll.u32 %s1704_s27, 8  ;;  %s1722_s23 = smov [#allocation10]  }
  0x98   : > { %1269 = vmatpush3.bf16.msra.mxu0 %v1459_v1  ;;  %1289 = vmatpush3.bf16.msra.mxu1 %v1468_v4  ;;  %v1464_v9 = vld [vmem:[#allocation5 + $0x28] sm:$0xff]   ;;  %v1471_v10 = vld [vmem:[#allocation7 + $0x18] sm:$0xff]   ;;  %v1465_v11 = vld [vmem:[#allocation5 + $0x30] sm:$0xff]   ;;  %s2044_s9 = scalar_select %p398_p12, %s1704_s27, 1 }
  0x99   : > { %1270 = vmatprep.subr.bf16.mxu0 %v1720_v0  ;;  %1290 = vmatprep.subr.bf16.mxu1 %v1720_v0  ;;  %v1472_v12 = vld [vmem:[#allocation7 + $0x20] sm:$0xff]   ;;  %v1466_v13 = vld [vmem:[#allocation5 + $0x38] sm:$0xff]   ;;  %v1473_v14 = vld [vmem:[#allocation7 + $0x28] sm:$0xff]   ;;  %s2090_s8 = scalar_lea.hbm %s2146_s7, %s1222_s14  ;;  %s1622_s1 = sshll.u32 %s1722_s23, 4  ;;  %s1623_s1 = int_to_ptr.vmem [resolvable:$false] %s1622_s1 }
  0x9a   : > { %v1467_v15 = vld [vmem:[%s1993_s18] sm:$0xff]   ;;  %v1476_v18 = vld [vmem:[#allocation7 + $0x40] sm:$0xff]   ;;  %v1477_v19 = vld [vmem:[#allocation7 + $0x48] sm:$0xff]   ;;  %s400_s13 = scalar_lea.vmem %s2141_s2, %s2044_s9  ;;  %s403_s10 = scalar_lea.vmem %s2145_s6, %s2044_s9 }
  0x9b   : > { %v1474_v16 = vld [vmem:[#allocation7 + $0x30] sm:$0xff]   ;;  %v1475_v17 = vld [vmem:[#allocation7 + $0x38] sm:$0xff]   ;;  %v1480_v22 = vld [vmem:[#allocation7 + $0x60] sm:$0xff]   ;;  %s396_s18 = scalar_lea.vmem [#allocation10], %s1165_s22  ;;  %s991_s9 = scalar_lea.sflag [#allocation4], %s1989_s15 }
  0x9c   : > { %1271 = vmatpush3.bf16.msra.mxu0 %v1460_v2  ;;  %1291 = vmatpush3.bf16.msra.mxu1 %v1469_v6  ;;  %v1478_v20 = vld [vmem:[#allocation7 + $0x50] sm:$0xff]   ;;  %v1479_v21 = vld [vmem:[#allocation7 + $0x58] sm:$0xff]   ;;  %v1481_v23 = vld [vmem:[#allocation7 + $0x68] sm:$0xff]   ;;  %s1006_s11 = sshll.u32 %s396_s18, 4  ;;  %s1624_s12 = scalar_lea.vmem %s1623_s1, 512  ;;  %s2085_s11 = int_to_ptr.vmem [resolvable:$true] %s1006_s11 }
  0x9d   : > { %1272 = vmatprep.subr.bf16.mxu0 %v1720_v0  ;;  %1292 = vmatprep.subr.bf16.mxu1 %v1720_v0  ;;  %v1166_v24 = vld [vmem:[%s400_s13] ss:$0 sm:$0xff]  ;;  %v1483_v33 = vld [vmem:[#allocation7 + $0x78] sm:$0xff]   ;;  %v1484_v34 = vld [vmem:[#allocation7 + $0x80] sm:$0xff]   ;;  %s1618_s27 = scalar_lea.vmem %s2085_s11, 256  ;;  %p1625_p9 = scmp.lt.s32.totalorder %s2085_s11, %s1623_s1 }
  0x9e   : > { %v1482_v32 = vld [vmem:[#allocation7 + $0x70] sm:$0xff]   ;;  %v1485_v35 = vld [vmem:[#allocation7 + $0x88] sm:$0xff]   ;;  %v1487_v37 = vld [vmem:[#allocation7 + $0x98] sm:$0xff]   ;;  %p1619_p5 = scmp.ne.s32.totalorder %s2085_s11, %s1618_s27  ;;  %p1626_p10 = scmp.lt.s32.totalorder %s1624_s12, %s1618_s27 }
  0x9f   : > { %v1486_v36 = vld [vmem:[#allocation7 + $0x90] sm:$0xff]   ;;  %v1488_v38 = vld [vmem:[#allocation7 + $0xa0] sm:$0xff]   ;;  %v1489_v39 = vld [vmem:[#allocation7 + $0xa8] sm:$0xff]  }
  0xa0   : > { %1273 = vmatpush3.bf16.msra.mxu0 %v1461_v3  ;;  %1293 = vmatpush3.bf16.msra.mxu1 %v1470_v8  ;;  %v1176_v40 = vld [vmem:[%s2143_s4] ss:$0 sm:$0xff]  ;;  %v1491_v51 = vld [vmem:[#allocation7 + $0xb8] sm:$0xff]   ;;  %v1492_v52 = vld [vmem:[#allocation8] sm:$0xff]   ;;  %p1620_p13 = pnand %p1619_p5, %p1931_p7  ;;  %p1627_p4 = por %p1626_p10, %p1625_p9 }
  0xa1   : > { %1274 = vmatprep.subr.bf16.mxu0 %v1720_v0  ;;  %1294 = vmatprep.subr.bf16.mxu1 %v1720_v0  ;;  %v1490_v50 = vld [vmem:[#allocation7 + $0xb0] sm:$0xff]   ;;  %v1493_v53 = vld [vmem:[#allocation8 + $0x8] sm:$0xff]   ;;  %v1495_v55 = vld [vmem:[#allocation8 + $0x18] sm:$0xff]  }
  0xa2   : > { %v1494_v54 = vld [vmem:[#allocation8 + $0x10] sm:$0xff]   ;;  %v1496_v56 = vld [vmem:[#allocation8 + $0x20] sm:$0xff]   ;;  %v1497_v57 = vld [vmem:[#allocation8 + $0x28] sm:$0xff]   ;;  %p1621_p3 = pneg %p1620_p13 }
  0xa3   : > { %v1186_v58 = vld [vmem:[%s2143_s4 + $0x1] ss:$0 sm:$0xff]  ;;  %v1499_v6 = vld [vmem:[#allocation8 + $0x38] sm:$0xff]  }
  0xa4   : > { %1275 = vmatpush3.bf16.msra.mxu0 %v1462_v5  ;;  %1295 = vmatpush3.bf16.msra.mxu1 %v1471_v10  ;;  %v1498_v5 = vld [vmem:[#allocation8 + $0x30] sm:$0xff]   ;;  %p1628_p8 = pnand %p1627_p4, %p1621_p3 }
  0xa5   : > { %1276 = vmatprep.subr.bf16.mxu0 %v1720_v0  ;;  %1296 = vmatprep.subr.bf16.mxu1 %v1720_v0 }
  0xa8   : > { %1277 = vmatpush3.bf16.msra.mxu0 %v1463_v7  ;;  %1297 = vmatpush3.bf16.msra.mxu1 %v1472_v12  ;;  %v1196_v7 = vld [vmem:[%s2143_s4 + $0x2] ss:$0 sm:$0xff] }
  0xa9   : > { %1278 = vmatprep.subr.bf16.mxu0 %v1720_v0  ;;  %1298 = vmatprep.subr.bf16.mxu1 %v1720_v0 }
  0xac   : > { %1279 = vmatpush3.bf16.msra.mxu0 %v1464_v9  ;;  %1299 = vmatpush3.bf16.msra.mxu1 %v1473_v14 }
  0xad   : > { %1280 = vmatprep.subr.bf16.mxu0 %v1720_v0  ;;  %1300 = vmatprep.subr.bf16.mxu1 %v1720_v0 }
  0xb0   : > { %1281 = vmatpush3.bf16.msra.mxu0 %v1465_v11  ;;  %1301 = vmatpush3.bf16.msra.mxu1 %v1474_v16 }
  0xb1   : > { %1282 = vmatprep.subr.bf16.mxu0 %v1720_v0  ;;  %1302 = vmatprep.subr.bf16.mxu1 %v1720_v0 }
  0xb4   : > { %1283 = vmatpush3.bf16.msra.mxu0 %v1466_v13  ;;  %1303 = vmatpush3.bf16.msra.mxu1 %v1475_v17 }
  0xb5   : > { %1308 = vmatprep.subr.bf16.mxu0 %v1720_v0  ;;  %1328 = vmatprep.subr.bf16.mxu1 %v1720_v0 }
  0xb7   : > { %1285 = vmatmul.mubr.bf16.vlgmr.msra.gmra.mrb[0].mxu0 %v1467_v15 }
  0xb8   : > { %1324 = vmatprep.mubr.msk.bf16.mxu0 %vm1721_vm0, %v1720_v0  ;;  %1309 = vmatpush3.bf16.msra.mxu0 %v1476_v18 }
  0xb9   : > { %1310 = vmatprep.subr.bf16.mxu0 %v1720_v0 }
  0xbc   : > { %1311 = vmatpush3.bf16.msra.mxu0 %v1477_v19 }
  0xbd   : > { %1312 = vmatprep.subr.bf16.mxu0 %v1720_v0 }
  0xc0   : > { %1313 = vmatpush3.bf16.msra.mxu0 %v1478_v20 }
  0xc1   : > { %1314 = vmatprep.subr.bf16.mxu0 %v1720_v0 }
  0xc4   : > { %1315 = vmatpush3.bf16.msra.mxu0 %v1479_v21 }
  0xc5   : > { %1316 = vmatprep.subr.bf16.mxu0 %v1720_v0 }
  0xc8   : > { %1317 = vmatpush3.bf16.msra.mxu0 %v1480_v22 }
  0xc9   : > { %1318 = vmatprep.subr.bf16.mxu0 %v1720_v0 }
  0xcc   : > { %1319 = vmatpush3.bf16.msra.mxu0 %v1481_v23 }
  0xcd   : > { %1320 = vmatprep.subr.bf16.mxu0 %v1720_v0 }
  0xd0   : > { %1321 = vmatpush3.bf16.msra.mxu0 %v1482_v32 }
  0xd1   : > { %1322 = vmatprep.subr.bf16.mxu0 %v1720_v0 }
  0xd4   : > { %1323 = vmatpush3.bf16.msra.mxu0 %v1483_v33 }
  0xd5   : > { %1348 = vmatprep.subr.bf16.mxu0 %v1720_v0 }
 0x18a   : > { %v519_v25 = vpop.f32.mrb[0].mxu0 }
 0x18b   : > { %v1286_v26 = vpop.f32.mrb[1].mxu0  ;;  %v520_v28 = vadd.f32 %v1166_v24, %v519_v25 }
 0x18c   : > { %v522_v27 = vpop.f32.mrb[2].mxu0 }
 0x18d   : > { %v523_v29 = vadd.f32 %v1166_v24, %v522_v27  ;;  %v1287_v30 = vpop.f32.mrb[3].mxu0 }
 0x18f   : > { %v526_v31 = vpack.c.bf16 %v523_v29, %v520_v28 }
 0x191   : > { %1305 = vmatmul.mubr.bf16.vlgmr.msra.gmra.mrb[0].mxu1 %v526_v31 }
 0x192   : > { %1344 = vmatprep.mubr.msk.bf16.mxu1 %vm1721_vm0, %v1720_v0  ;;  %1329 = vmatpush3.bf16.msra.mxu1 %v1484_v34 }
 0x193   : > { %1330 = vmatprep.subr.bf16.mxu1 %v1720_v0 }
 0x196   : > { %1331 = vmatpush3.bf16.msra.mxu1 %v1485_v35 }
 0x197   : > { %1332 = vmatprep.subr.bf16.mxu1 %v1720_v0 }
 0x19a   : > { %1333 = vmatpush3.bf16.msra.mxu1 %v1486_v36 }
 0x19b   : > { %1334 = vmatprep.subr.bf16.mxu1 %v1720_v0 }
 0x19e   : > { %1335 = vmatpush3.bf16.msra.mxu1 %v1487_v37 }
 0x19f   : > { %1336 = vmatprep.subr.bf16.mxu1 %v1720_v0 }
 0x1a2   : > { %1337 = vmatpush3.bf16.msra.mxu1 %v1488_v38 }
 0x1a3   : > { %1338 = vmatprep.subr.bf16.mxu1 %v1720_v0 }
 0x1a6   : > { %1339 = vmatpush3.bf16.msra.mxu1 %v1489_v39 }
 0x1a7   : > { %1340 = vmatprep.subr.bf16.mxu1 %v1720_v0 }
 0x1aa   : > { %1341 = vmatpush3.bf16.msra.mxu1 %v1490_v50 }
 0x1ab   : > { %1342 = vmatprep.subr.bf16.mxu1 %v1720_v0 }
 0x1ae   : > { %1343 = vmatpush3.bf16.msra.mxu1 %v1491_v51 }
 0x264   : > { %v632_v41 = vpop.f32.mrb[0].mxu1 }
 0x265   : > { %v633_v42 = vadd.f32 %v1176_v40, %v632_v41  ;;  %v1306_v43 = vpop.f32.mrb[1].mxu1 }
 0x266   : > { %v635_v44 = vpop.f32.mrb[2].mxu1 }
 0x267   : > { %v636_v45 = vadd.f32 %v1176_v40, %v635_v44  ;;  %v1307_v46 = vpop.f32.mrb[3].mxu1  ;;  %v639_v47 = vmax.f32 %v633_v42, 0.0 }
 0x269   : > { %v640_v48 = vmax.f32 %v636_v45, 0.0 }
 0x26b   : > { %v641_v49 = vpack.c.bf16 %v640_v48, %v639_v47 }
 0x26d   : > { %1325 = vmatmul.mubr.bf16.vlgmr.msra.gmra.mrb[4].mxu0 %v641_v49 }
 0x26e   : > { %1364 = vmatprep.mubr.msk.bf16.mxu0 %vm1721_vm0, %v1720_v0  ;;  %1349 = vmatpush3.bf16.msra.mxu0 %v1492_v52 }
 0x26f   : > { %1350 = vmatprep.subr.bf16.mxu0 %v1720_v0 }
 0x272   : > { %1351 = vmatpush3.bf16.msra.mxu0 %v1493_v53 }
 0x273   : > { %1352 = vmatprep.subr.bf16.mxu0 %v1720_v0 }
 0x276   : > { %1353 = vmatpush3.bf16.msra.mxu0 %v1494_v54 }
 0x277   : > { %1354 = vmatprep.subr.bf16.mxu0 %v1720_v0 }
 0x27a   : > { %1355 = vmatpush3.bf16.msra.mxu0 %v1495_v55 }
 0x27b   : > { %1356 = vmatprep.subr.bf16.mxu0 %v1720_v0 }
 0x27e   : > { %1357 = vmatpush3.bf16.msra.mxu0 %v1496_v56 }
 0x27f   : > { %1358 = vmatprep.subr.bf16.mxu0 %v1720_v0 }
 0x282   : > { %1359 = vmatpush3.bf16.msra.mxu0 %v1497_v57 }
 0x283   : > { %1360 = vmatprep.subr.bf16.mxu0 %v1720_v0 }
 0x286   : > { %1361 = vmatpush3.bf16.msra.mxu0 %v1498_v5 }
 0x287   : > { %1362 = vmatprep.subr.bf16.mxu0 %v1720_v0  ;;  %v1205_v0 = vld [vmem:[%s403_s10] ss:$0 sm:$0xff] }
 0x28a   : > { %1363 = vmatpush3.bf16.msra.mxu0 %v1499_v6 }
 0x340   : > { %v749_v59 = vpop.f32.mrb[4].mxu0 }
 0x341   : > { %v750_v60 = vadd.f32 %v1186_v58, %v749_v59  ;;  %v1326_v61 = vpop.f32.mrb[5].mxu0 }
 0x342   : > { %v752_v62 = vpop.f32.mrb[6].mxu0 }
 0x343   : > { %v753_v63 = vadd.f32 %v1186_v58, %v752_v62  ;;  %v1327_v1 = vpop.f32.mrb[7].mxu0  ;;  %v756_v2 = vmax.f32 %v750_v60, 0.0 }
 0x345   : > { %v757_v3 = vmax.f32 %v753_v63, 0.0 }
 0x347   : > { %v758_v4 = vpack.c.bf16 %v757_v3, %v756_v2 }
 0x349   : > { %1345 = vmatmul.mubr.bf16.vlgmr.msra.gmra.mrb[4].mxu1 %v758_v4 }
 0x41c   : > { %v866_v8 = vpop.f32.mrb[4].mxu1 }
 0x41d   : > { %v867_v9 = vadd.f32 %v1196_v7, %v866_v8  ;;  %v1346_v10 = vpop.f32.mrb[5].mxu1 }
 0x41e   : > { %v869_v11 = vpop.f32.mrb[6].mxu1 }
 0x41f   : > { %v870_v12 = vadd.f32 %v1196_v7, %v869_v11  ;;  %v1347_v13 = vpop.f32.mrb[7].mxu1  ;;  %v873_v14 = vmax.f32 %v867_v9, 0.0 }
 0x421   : > { %v874_v15 = vmax.f32 %v870_v12, 0.0 }
 0x423   : > { %v875_v16 = vpack.c.bf16 %v874_v15, %v873_v14 }
 0x425   : > { %1365 = vmatmul.mubr.bf16.vlgmr.msra.gmra.mrb[8].mxu0 %v875_v16 }
 0x4f8   : > { %v981_v17 = vpop.f32.mrb[8].mxu0 }
 0x4f9   : > { %v982_v18 = vadd.f32 %v1205_v0, %v981_v17  ;;  %v1366_v19 = vpop.f32.mrb[9].mxu0 }
 0x4fa   : > { %v984_v20 = vpop.f32.mrb[10].mxu0 }
 0x4fb   : > { %988 = vst [vmem:[%s396_s18] sm:$0xff] %v982_v18  ;;  %v985_v21 = vadd.f32 %v1205_v0, %v984_v20  ;;  %v1367_v22 = vpop.f32.mrb[11].mxu0 }
 0x4fd   : > { %989 = vst [vmem:[%s396_s18 + $0x8] sm:$0xff] %v985_v21 }
 0x4fe   : > { %1631 = shalt.err (!%p1628_p8)
}
 0x4ff   : > { %s1632_s16 = scalar_lea.hbm %s2090_s8, 256  ;;  %s1636_s21 = scalar_lea.hbm %s2146_s7, 512 }
 0x500   : > { %p1633_p6 = scmp.ne.s32.totalorder %s2090_s8, %s1632_s16  ;;  %p1637_p2 = scmp.lt.u32.totalorder %s2090_s8, %s2146_s7 }
 0x501   : > { %p1638_p0 = scmp.lt.u32.totalorder %s1636_s21, %s1632_s16  ;;  %p1640_p5 = scmp.lt.u32.totalorder %s1632_s16, %s2090_s8 }
 0x502   : > { %p1634_p11 = pnand %p1633_p6, %p1931_p7 }
 0x503   : > { %p1639_p12 = por %p1638_p0, %p1637_p2 }
 0x504   : > { %p1635_p1 = pneg %p1634_p11 }
 0x505   : > { %p1641_p13 = por %p1640_p5, %p1639_p12 }
 0x507   : > { %p1642_p3 = pnand %p1641_p13, %p1635_p1 }
 0x509   : > { %1645 = shalt.err (!%p1642_p3)
}
 0x50a   : > { %s1723_s14 = smov 128   ;;  %s1724_s13 = smov 8  }
 0x50b   : > { %1378 = dma.vmem_to_hbm [thread:$0]  (%p1931_p7), %s2085_s11, 256, %s2090_s8, %s991_s9, %s1723_s14, %s1723_s14, %s1724_s13  }
 0x50c PF: > { %s2181_s30 = sld [smem:[#allocation16_spill]]  ;;  %s2182_s27 = sld [smem:[#allocation17_spill]] }
 0x50d   : > { %p2184_p10 = scmp.ge.s32.totalorder %s1712_s29, 2 }
 0x512   : > { %s1021_s23 = sand.u32 1, %s2181_s30   ;;  %p2183_p9 = scmp.ne.s32.totalorder %s2182_s27, 0 }
 0x513   : > { %s1022_s1 = scalar_lea.sflag [#allocation4], %s1021_s23 }
 0x514   : > { %p1395_p4 = pnand %p2184_p10, %p2183_p9 }
 0x516   : > { %1687 = dma.done.wait (!%p1395_p4), %s1022_s1, 256  }
 0x517   : > { %1689 = vsyncadd (!%p1395_p4), %s1022_s1, 4294967040  ;;  %s25_s29 = sadd.s32 1, %s1712_s29   ;;  %s2185_s20 = smov %s2192_s24 }
 0x518   : > { %p22_p8 = scmp.ge.s32.totalorder %s25_s29, 4   ;;  %s2186_s24 = smov %s1696_s25 }
 0x519   : > { %s2187_s25 = smov %s1700_s26  ;;  %s2188_s26 = smov %s1940_s17 }
 0x51a   : > { %s2189_s27 = smov %s1708_s28  ;;  %s2190_s28 = smov %s2185_s20 }
 0x51b   :  { %24 = sbr.rel (!%p22_p8) target bundleno = 10 (0xa), region = 117 }
 0x522   :  { %1027 = vsyncpa [#allocation3], 1 }
 0x523   :  { %1029 = vsyncpa [#allocation3 + $0x1], 1 }
 0x524   :  { %1030 = vsyncpa [#allocation6], 1 }
 0x525   :  { %1031 = vsyncpa [#allocation9], 1 }
 0x526   :  { %1032 = vsyncpa [#allocation4], 1 }
 0x527   :  { %1034 = vsyncpa [#allocation4 + $0x1], 1 }

// kernel: tpu_custom_call.1
= control target key start
LH: loop header
LB: loop body
LE: loop exit
PB: predicated region body
PF: predicated region fallthrough
CT: control target
= control target key end

     0   :  { %s2245_s0 = inlined_call_operand.hbm [shape: bf16[2,16,128], index: 0, kind: input, shape index: {}]   ;;  %s2246_s1 = inlined_call_operand.hbm [shape: bf16[2,128,128], index: 1, kind: input, shape index: {}]   ;;  %s2247_s2 = inlined_call_operand.vmem [shape: f32[2,1,128], index: 2, kind: input, shape index: {}]   ;;  %s2248_s3 = inlined_call_operand.hbm [shape: bf16[3,128,128], index: 3, kind: input, shape index: {}]   ;;  %s2249_s4 = inlined_call_operand.vmem [shape: f32[3,1,128], index: 4, kind: input, shape index: {}]   ;;  %s2250_s5 = inlined_call_operand.hbm [shape: bf16[2,128,128], index: 5, kind: input, shape index: {}]   ;;  %s2251_s6 = inlined_call_operand.vmem [shape: f32[2,1,128], index: 6, kind: input, shape index: {}]   ;;  %s2252_s7 = inlined_call_operand.hbm [shape: f32[2,16,128], index: 7, kind: output, shape index: {}]  }
   0x1   :  { %2265 = sst [smem:[#allocation19_spill]] %s2245_s0 }
   0x2   :  { %2266 = sst [smem:[#allocation20_spill]] %s2248_s3 }
   0x3   :  { %2267 = sst [smem:[#allocation21_spill]] %s2251_s6 }
   0x4   :  { %2268 = sst [smem:[#allocation22_spill]] %s2252_s7 }
   0x5   :  { %12 = vsyncpa [#allocation3], 0 }
   0x6   :  { %14 = vsyncpa [#allocation3 + $0x1], 0 }
   0x7   :  { %15 = vsyncpa [#allocation6], 0 }
   0x8   :  { %17 = vsyncpa [#allocation6 + $0x1], 0 }
   0x9   :  { %18 = vsyncpa [#allocation9], 0 }
   0xa   :  { %20 = vsyncpa [#allocation9 + $0x1], 0 }
   0xb   :  { %21 = vsyncpa [#allocation4], 0 }
   0xc   :  { %23 = vsyncpa [#allocation4 + $0x1], 0  ;;  %s1817_s24 = smov 0   ;;  %s1819_s25 = smov 0  }
   0xd   :  { %s1821_s26 = smov 0   ;;  %s1823_s27 = smov 0  }
   0xe   :  { %s1825_s28 = smov 0   ;;  %s1827_s29 = smov 0  }
   0xf LB: > { %2269 = sst [smem:[#allocation16_spill]] %s1744_s24  ;;  %s1848_s30 = sadd.s32 4294967295, %s1764_s29   ;;  %s1764_s29 = sphi %s1827_s29, %s29_s29   ;;  %s1760_s28 = sphi %s1825_s28, %s2306_s28   ;;  %s1756_s27 = sphi %s1823_s27, %s2305_s27   ;;  %s1752_s26 = sphi %s1821_s26, %s2304_s26   ;;  %s1748_s25 = sphi %s1819_s25, %s2303_s25   ;;  %s1744_s24 = sphi %s1817_s24, %s2302_s24  }
  0x10   : > { %s1201_s8 = sadd.s32 4294967294, %s1764_s29   ;;  %p57_p0 = scmp.ne.s32.totalorder %s1752_s26, %s1748_s25 }
  0x11   : > { %p58_p1 = scmp.eq.s32.totalorder %s1764_s29, 0  ;;  %p63_p2 = scmp.ne.s32.totalorder %s1748_s25, %s1744_s24 }
  0x12   : > { %p2254_p3 = scmp.eq.s32.totalorder %s1848_s30, 0  ;;  %p235_p4 = scmp.eq.s32.totalorder %s1848_s30, 1 }
  0x13   : > { %p1859_p5 = por %p58_p1, %p57_p0  ;;  %p241_p6 = scmp.eq.s32.totalorder %s1201_s8, 1 }
  0x14   : > { %p1865_p7 = por %p2254_p3, %p63_p2  ;;  %p1869_p8 = por %p235_p4, %p57_p0 }
  0x15   : > { %s2270_s10 = scalar_select %p1859_p5, 1, 0 }
  0x16   : > { %s2271_s11 = scalar_select %p1865_p7, 1, 0 }
  0x17   : > { %s2272_s12 = scalar_select %p1869_p8, 1, 0 }
  0x18   : > { %p1873_p9 = por %p241_p6, %p63_p2  ;;  %p1202_p10 = scmp.ge.s32.totalorder %s1764_s29, 1 }
  0x19   : > { %2273 = sst [smem:[#allocation17_spill]] %s2272_s12  ;;  %p248_p11 = scmp.lt.s32.totalorder %s1764_s29, 3 }
  0x1a   : > { %s2274_s13 = scalar_select %p1873_p9, 1, 0 }
  0x1b   : > { %p1879_p12 = pnand %p1202_p10, %p248_p11  ;;  %s1766_s15 = smov [#allocation7]  }
  0x1c   : > { %2275 = sst [smem:[#allocation18_spill]] %s2274_s13  ;;  %s260_s16 = sshll.u32 %s1766_s15, 4  ;;  %s1883_s16 = int_to_ptr.vmem [resolvable:$true] %s260_s16 }
  0x1d   : > { %s2276_s14 = scalar_select %p1879_p12, 1, 0 }
  0x1e   : > { %p1434_p13 = pneg %p1879_p12  ;;  %s41_s18 = sadd.s32 1, %s1760_s28 }
  0x1f   : > { %s1897_s19 = sand.u32 1, %s1752_s26   ;;  %p1899_p4 = scmp.ge.s32.totalorder %s41_s18, 2 }
  0x20   : > { %p1891_p2 = pnand %p1434_p13, %p2254_p3  ;;  %s2279_s3 = sld [smem:[#allocation20_spill]] }
  0x21   : > { %s2278_s20 = scalar_select %p1899_p4, 1, 0 }
  0x22   : > { %p1554_p10 = pneg %p1891_p2 }
  0x26   : > { %s1552_s23 = scalar_lea.hbm %s2279_s3, 3072 }
  0x27   : > { %p1553_p6 = scmp.ne.s32.totalorder %s2279_s3, %s1552_s23  ;;  %p1559_p0 = scmp.lt.u32.totalorder %s1552_s23, %s2279_s3 }
  0x29   : > { %p1555_p11 = pnand %p1554_p10, %p1553_p6 }
  0x2b   : > { %p1556_p13 = pneg %p1555_p11 }
  0x2d   : > { %p1561_p3 = pnand %p1559_p0, %p1556_p13 }
  0x2f   : > { %1564 = shalt.err (!%p1561_p3)
}
  0x30   : > { %s1565_s24 = scalar_lea.vmem %s1883_s16, 3072  ;;  %p1573_p7 = scmp.lt.s32.totalorder %s1883_s16, %s1883_s16 }
  0x31   : > { %p1566_p1 = scmp.ne.s32.totalorder %s1883_s16, %s1565_s24  ;;  %p1574_p12 = scmp.lt.s32.totalorder %s1565_s24, %s1565_s24 }
  0x33   : > { %p1568_p9 = pnand %p1566_p1, %p1554_p10  ;;  %p1575_p5 = por %p1574_p12, %p1573_p7 }
  0x35   : > { %p1569_p8 = pneg %p1568_p9 }
  0x37   : > { %p1576_p4 = pnand %p1575_p5, %p1569_p8 }
  0x39   : > { %1579 = shalt.err (!%p1576_p4)
}
  0x3a   : > { %s2262_s21 = smov 64   ;;  %s1768_s9 = smov 4  }
  0x3b   : > { %1437 = dma.hbm_to_vmem [thread:$0]  (!%p1891_p2), %s2279_s3, 3072, %s1883_s16, [#allocation6], %s2262_s21, %s2262_s21, %s1768_s9  }
  0x3c   : > { %p2280_p3 = scmp.ne.s32.totalorder %s2278_s20, 0  ;;  %s1205_s22 = sshll.u32 %s1897_s19, 3 }
  0x3d   : > { %s1273_s8 = sshll.u32 %s1760_s28, 7  ;;  %s2281_s0 = sld [smem:[#allocation19_spill]] }
  0x3e   : > { %s2308_s18 = smov (%p2280_p3, %s41_s18), 0  ;;  %s281_s17 = scalar_lea.vmem [#allocation2], %s1205_s22 }
  0x3f   : > { %s45_s23 = ssub.s32 %s1760_s28, %s2308_s18  ;;  %s290_s6 = sshll.u32 %s281_s17, 4  ;;  %s1945_s6 = int_to_ptr.vmem [resolvable:$true] %s290_s6 }
  0x40   : > { %p48_p5 = scmp.eq.s32.totalorder %s45_s23, 0  ;;  %s2282_s24 = sadd.s32 1, %s1752_s26 }
  0x41   : > { %p2283_p7 = scmp.ne.s32.totalorder %s2270_s10, 0  ;;  %p2284_p8 = scmp.lt.s32.totalorder %s1764_s29, 2 }
  0x42   : > { %s1943_s16 = scalar_select %p48_p5, %s1752_s26, %s2282_s24  }
  0x43   : > { %s1938_s12 = scalar_lea.hbm %s2281_s0, %s1273_s8  ;;  %p1951_p9 = pnand %p2284_p8, %p2283_p7 }
  0x44   : > { %s1208_s13 = sshll.u32 %s1897_s19, 6  ;;  %s278_s23 = scalar_lea.sflag [#allocation3], %s1897_s19 }
  0x45   : > { %s1580_s8 = scalar_lea.hbm %s1938_s12, 128  ;;  %p1962_p0 = pneg %p1951_p9 }
  0x46   : > { %p1581_p12 = scmp.ne.s32.totalorder %s1938_s12, %s1580_s8  ;;  %s1585_s17 = scalar_lea.hbm %s2281_s0, 256 }
  0x47   : > { %p1586_p4 = scmp.lt.u32.totalorder %s1938_s12, %s2281_s0  ;;  %p1587_p6 = scmp.lt.u32.totalorder %s1585_s17, %s1580_s8 }
  0x48   : > { %p1583_p1 = pnand %p1962_p0, %p1581_p12  ;;  %p1589_p11 = scmp.lt.u32.totalorder %s1580_s8, %s1938_s12 }
  0x49   : > { %p1588_p10 = por %p1587_p6, %p1586_p4 }
  0x4a   : > { %p1584_p2 = pneg %p1583_p1 }
  0x4b   : > { %p1590_p13 = por %p1589_p11, %p1588_p10 }
  0x4d   : > { %p1591_p3 = pnand %p1590_p13, %p1584_p2 }
  0x4f   : > { %1594 = shalt.err (!%p1591_p3)
}
  0x50   : > { %s1595_s7 = scalar_lea.vmem %s1945_s6, 128  ;;  %s1769_s10 = smov [#allocation2]  }
  0x51   : > { %p1596_p5 = scmp.ne.s32.totalorder %s1945_s6, %s1595_s7  ;;  %s1600_s15 = sshll.u32 %s1769_s10, 4  ;;  %s1601_s15 = int_to_ptr.vmem [resolvable:$false] %s1600_s15 }
  0x52   : > { %s1602_s21 = scalar_lea.vmem %s1601_s15, 256  ;;  %p1603_p12 = scmp.lt.s32.totalorder %s1945_s6, %s1601_s15 }
  0x53   : > { %p1598_p7 = pnand %p1596_p5, %p1962_p0  ;;  %p1604_p1 = scmp.lt.s32.totalorder %s1602_s21, %s1595_s7 }
  0x55   : > { %p1599_p8 = pneg %p1598_p7  ;;  %p1605_p4 = por %p1604_p1, %p1603_p12 }
  0x57   : > { %p1606_p6 = pnand %p1605_p4, %p1599_p8 }
  0x59   : > { %1609 = shalt.err (!%p1606_p6)
}
  0x5a   : > { %s2287_s8 = smov 64   ;;  %s2264_s17 = sshll.u32 %s1760_s28, 10 }
  0x5b   : > { %1441 = dma.hbm_to_vmem [thread:$0]  (!%p1951_p9), %s1938_s12, 128, %s1945_s6, %s278_s23, %s2287_s8, %s2287_s8, %s1768_s9  }
  0x5c   : > { %s1996_s10 = scalar_lea.hbm %s2246_s1, %s2264_s17  ;;  %s304_s15 = scalar_lea.vmem [#allocation5], %s1208_s13 }
  0x5d   : > { %s311_s21 = sshll.u32 %s304_s15, 4  ;;  %s2288_s0 = sand.u32 1, %s1764_s29   ;;  %s2000_s21 = int_to_ptr.vmem [resolvable:$true] %s311_s21 }
  0x5e   : > { %s2004_s3 = scalar_lea.sflag [#allocation6], %s2288_s0  ;;  %s1610_s6 = scalar_lea.hbm %s1996_s10, 1024 }
  0x5f   : > { %p1611_p2 = scmp.ne.s32.totalorder %s1996_s10, %s1610_s6  ;;  %s1615_s7 = scalar_lea.hbm %s2246_s1, 2048 }
  0x60   : > { %p1616_p13 = scmp.lt.u32.totalorder %s1996_s10, %s2246_s1  ;;  %p1617_p3 = scmp.lt.u32.totalorder %s1615_s7, %s1610_s6 }
  0x61   : > { %p1613_p10 = pnand %p1611_p2, %p1962_p0  ;;  %p1619_p7 = scmp.lt.u32.totalorder %s1610_s6, %s1996_s10 }
  0x62   : > { %p1618_p5 = por %p1617_p3, %p1616_p13 }
  0x63   : > { %p1614_p11 = pneg %p1613_p10 }
  0x64   : > { %p1620_p8 = por %p1619_p7, %p1618_p5 }
  0x66   : > { %p1621_p12 = pnand %p1620_p8, %p1614_p11 }
  0x68   : > { %1624 = shalt.err (!%p1621_p12)
}
  0x69   : > { %s1625_s0 = scalar_lea.vmem %s2000_s21, 1024  ;;  %s1770_s15 = smov [#allocation5]  }
  0x6a   : > { %p1626_p1 = scmp.ne.s32.totalorder %s2000_s21, %s1625_s0  ;;  %s1630_s12 = sshll.u32 %s1770_s15, 4  ;;  %s1631_s12 = int_to_ptr.vmem [resolvable:$false] %s1630_s12 }
  0x6b   : > { %s1632_s17 = scalar_lea.vmem %s1631_s12, 2048  ;;  %p1633_p2 = scmp.lt.s32.totalorder %s2000_s21, %s1631_s12 }
  0x6c   : > { %p1628_p4 = pnand %p1626_p1, %p1962_p0  ;;  %p1634_p10 = scmp.lt.s32.totalorder %s1632_s17, %s1625_s0 }
  0x6e   : > { %p1629_p6 = pneg %p1628_p4  ;;  %p1635_p13 = por %p1634_p10, %p1633_p2 }
  0x70   : > { %p1636_p3 = pnand %p1635_p13, %p1629_p6 }
  0x72   : > { %1639 = shalt.err (!%p1636_p3)
}
  0x73   : > { %1444 = dma.hbm_to_vmem [thread:$0]  (!%p1951_p9), %s1996_s10, 1024, %s2000_s21, %s2004_s3, %s2287_s8, %s2287_s8, %s1768_s9  }
  0x74   : > { %s2289_s6 = sshll.u32 %s1760_s28, 10  ;;  %s331_s0 = scalar_lea.vmem [#allocation8], %s1208_s13 }
  0x75   : > { %s2036_s24 = scalar_lea.hbm %s2250_s5, %s2289_s6  ;;  %s338_s15 = sshll.u32 %s331_s0, 4  ;;  %s2040_s15 = int_to_ptr.vmem [resolvable:$true] %s338_s15 }
  0x76   : > { %s328_s12 = scalar_lea.sflag [#allocation9], %s1897_s19  ;;  %s1640_s17 = scalar_lea.hbm %s2036_s24, 1024 }
  0x77   : > { %p1641_p11 = scmp.ne.s32.totalorder %s2036_s24, %s1640_s17  ;;  %s1645_s21 = scalar_lea.hbm %s2250_s5, 2048 }
  0x78   : > { %p1646_p8 = scmp.lt.u32.totalorder %s2036_s24, %s2250_s5  ;;  %p1647_p12 = scmp.lt.u32.totalorder %s1645_s21, %s1640_s17 }
  0x79   : > { %p1643_p5 = pnand %p1641_p11, %p1962_p0  ;;  %p1649_p4 = scmp.lt.u32.totalorder %s1640_s17, %s2036_s24 }
  0x7a   : > { %p1648_p1 = por %p1647_p12, %p1646_p8 }
  0x7b   : > { %p1644_p7 = pneg %p1643_p5 }
  0x7c   : > { %p1650_p6 = por %p1649_p4, %p1648_p1 }
  0x7e   : > { %p1651_p2 = pnand %p1650_p6, %p1644_p7 }
  0x80   : > { %1654 = shalt.err (!%p1651_p2)
}
  0x81   : > { %s1655_s13 = scalar_lea.vmem %s2040_s15, 1024  ;;  %s1771_s7 = smov [#allocation8]  }
  0x82   : > { %p1656_p10 = scmp.ne.s32.totalorder %s2040_s15, %s1655_s13  ;;  %s1660_s0 = sshll.u32 %s1771_s7, 4  ;;  %s1661_s0 = int_to_ptr.vmem [resolvable:$false] %s1660_s0 }
  0x83   : > { %s1662_s3 = scalar_lea.vmem %s1661_s0, 2048  ;;  %p1663_p11 = scmp.lt.s32.totalorder %s2040_s15, %s1661_s0 }
  0x84   : > { %p1658_p13 = pnand %p1656_p10, %p1962_p0  ;;  %p1664_p5 = scmp.lt.s32.totalorder %s1662_s3, %s1655_s13 }
  0x86   : > { %p1659_p3 = pneg %p1658_p13  ;;  %p1665_p8 = por %p1664_p5, %p1663_p11 }
  0x88   : > { %p1666_p12 = pnand %p1665_p8, %p1659_p3 }
  0x8a   : > { %1669 = shalt.err (!%p1666_p12)
}
  0x8b   : > { %1447 = dma.hbm_to_vmem [thread:$0]  (!%p1951_p9), %s2036_s24, 1024, %s2040_s15, %s328_s12, %s2287_s8, %s2287_s8, %s1768_s9  }
  0x8c   : > { %p2290_p0 = scmp.ne.s32.totalorder %s2276_s14, 0 }
  0x8d   : > { %s2072_s22 = sand.u32 (!%p2290_p0), 1, %s1748_s25   ;;  %p2291_p7 = scmp.ne.s32.totalorder (!%p2290_p0), %s2271_s11, 0 }
  0x8e   : > { %356 = sbr.rel (%p2290_p0) target bundleno = 1302 (0x516), region = 48  ;;  %s1215_s17 = sshll.u32 (!%p2290_p0), %s2072_s22, 3 }
  0x8f   : > { %s359_s10 = scalar_lea.sflag (!%p2290_p0), [#allocation3], %s2072_s22  ;;  %s2076_s20 = scalar_lea.vmem (!%p2290_p0), [#allocation2], %s1215_s17 }
  0x95   : > { %1723 = dma.done.wait (%p2291_p7), %s359_s10, 128  }
  0x96   : > { %1725 = vsyncadd (%p2291_p7), %s359_s10, 4294967168  ;;  %s367_s14 = sand.u32 1, %s1848_s30   ;;  %s1216_s19 = sshll.u32 %s2072_s22, 6 }
  0x97   : > { %s368_s9 = scalar_lea.sflag [#allocation6], %s367_s14  ;;  %s2084_s8 = scalar_lea.vmem [#allocation5], %s1216_s19 }
  0x98   : > { %1727 = dma.done.wait (%p2291_p7), %s368_s9, 1024  }
  0x99   : > { %1729 = vsyncadd (%p2291_p7), %s368_s9, 4294966272  ;;  %p2292_p9 = scmp.eq.s32.totalorder %s1848_s30, 0 }
  0x9b   : > { %1731 = dma.done.wait (%p2292_p9), [#allocation6], 3072   ;;  %p2293_p1 = pmov %p2292_p9 }
  0x9c   : > { %s381_s24 = scalar_lea.sflag [#allocation9], %s2072_s22  ;;  %s2095_s15 = scalar_lea.vmem [#allocation8], %s1216_s19 }
  0x9d   : > { %1733 = vsyncadd (%p2293_p1), [#allocation6], 4294964224 }
  0x9e   : > { %1735 = dma.done.wait (%p2291_p7), %s381_s24, 1024  }
  0x9f   : > { %1737 = vsyncadd (%p2291_p7), %s381_s24, 4294966272  ;;  %v1772_v0 = vmov 0.0   ;;  %vm1773_vm0 = vmmov 0   ;;  %v1511_v1 = vld [vmem:[%s2084_s8] sm:$0xff]   ;;  %v1512_v2 = vld [vmem:[%s2084_s8 + $0x8] sm:$0xff]   ;;  %p432_p4 = scmp.lt.s32.totalorder %s1756_s27, 1 }
  0xa0   : > { %1322 = vmatprep.subr.bf16.mxu0 %v1772_v0  ;;  %1338 = vmatprep.mubr.msk.bf16.mxu0 %vm1773_vm0, %v1772_v0  ;;  %v1513_v3 = vld [vmem:[%s2084_s8 + $0x10] sm:$0xff]   ;;  %v1520_v4 = vld [vmem:[#allocation7] sm:$0xff]   ;;  %v1514_v5 = vld [vmem:[%s2084_s8 + $0x18] sm:$0xff]   ;;  %s1219_s17 = sshll.u32 %s2072_s22, 4  ;;  %s2294_s14 = sld [smem:[#allocation21_spill]] }
  0xa1   : > { %1342 = vmatprep.subr.bf16.mxu1 %v1772_v0  ;;  %1358 = vmatprep.mubr.msk.bf16.mxu1 %vm1773_vm0, %v1772_v0  ;;  %v1521_v6 = vld [vmem:[#allocation7 + $0x8] sm:$0xff]   ;;  %v1515_v7 = vld [vmem:[%s2084_s8 + $0x20] sm:$0xff]   ;;  %v1522_v8 = vld [vmem:[#allocation7 + $0x10] sm:$0xff]   ;;  %s2142_s30 = scalar_select %p432_p4, %s1756_s27, 1 }
  0xa2   : > { %1323 = vmatpush3.bf16.msra.mxu0 %v1511_v1  ;;  %1343 = vmatpush3.bf16.msra.mxu1 %v1520_v4  ;;  %v1516_v9 = vld [vmem:[%s2084_s8 + $0x28] sm:$0xff]   ;;  %v1523_v10 = vld [vmem:[#allocation7 + $0x18] sm:$0xff]   ;;  %v1517_v11 = vld [vmem:[%s2084_s8 + $0x30] sm:$0xff]   ;;  %s430_s9 = scalar_lea.vmem [#allocation10], %s1219_s17  ;;  %s1774_s23 = smov [#allocation10]  }
  0xa3   : > { %1324 = vmatprep.subr.bf16.mxu0 %v1772_v0  ;;  %1344 = vmatprep.subr.bf16.mxu1 %v1772_v0  ;;  %v1524_v12 = vld [vmem:[#allocation7 + $0x20] sm:$0xff]   ;;  %v1518_v13 = vld [vmem:[%s2084_s8 + $0x38] sm:$0xff]   ;;  %v1525_v14 = vld [vmem:[#allocation7 + $0x28] sm:$0xff]   ;;  %s434_s21 = scalar_lea.vmem %s2247_s2, %s2142_s30  ;;  %s2295_s8 = sld [smem:[#allocation17_spill]] }
  0xa4   : > { %v1519_v15 = vld [vmem:[%s2076_s20] sm:$0xff]   ;;  %v1528_v18 = vld [vmem:[#allocation7 + $0x40] sm:$0xff]   ;;  %v1529_v19 = vld [vmem:[#allocation7 + $0x48] sm:$0xff]   ;;  %s1040_s24 = sshll.u32 %s430_s9, 4  ;;  %s1674_s13 = sshll.u32 %s1774_s23, 4  ;;  %s2191_s24 = int_to_ptr.vmem [resolvable:$true] %s1040_s24  ;;  %s1675_s13 = int_to_ptr.vmem [resolvable:$false] %s1674_s13 }
  0xa5   : > { %v1526_v16 = vld [vmem:[#allocation7 + $0x30] sm:$0xff]   ;;  %v1527_v17 = vld [vmem:[#allocation7 + $0x38] sm:$0xff]   ;;  %v1532_v22 = vld [vmem:[#allocation7 + $0x60] sm:$0xff]   ;;  %s1676_s7 = scalar_lea.vmem %s1675_s13, 512  ;;  %p1677_p3 = scmp.lt.s32.totalorder %s2191_s24, %s1675_s13 }
  0xa6   : > { %1325 = vmatpush3.bf16.msra.mxu0 %v1512_v2  ;;  %1345 = vmatpush3.bf16.msra.mxu1 %v1521_v6  ;;  %v1530_v20 = vld [vmem:[#allocation7 + $0x50] sm:$0xff]   ;;  %v1531_v21 = vld [vmem:[#allocation7 + $0x58] sm:$0xff]   ;;  %v1533_v23 = vld [vmem:[#allocation7 + $0x68] sm:$0xff]   ;;  %s437_s19 = scalar_lea.vmem %s2294_s14, %s2142_s30  ;;  %s1025_s30 = scalar_lea.sflag [#allocation4], %s2072_s22 }
  0xa7   : > { %1326 = vmatprep.subr.bf16.mxu0 %v1772_v0  ;;  %1346 = vmatprep.subr.bf16.mxu1 %v1772_v0  ;;  %v1220_v24 = vld [vmem:[%s434_s21] ss:$0 sm:$0xff]  ;;  %v1535_v33 = vld [vmem:[#allocation7 + $0x78] sm:$0xff]   ;;  %v1536_v34 = vld [vmem:[#allocation7 + $0x80] sm:$0xff]   ;;  %s2296_s21 = sld [smem:[#allocation22_spill]] }
  0xa8   : > { %v1534_v32 = vld [vmem:[#allocation7 + $0x70] sm:$0xff]   ;;  %v1537_v35 = vld [vmem:[#allocation7 + $0x88] sm:$0xff]   ;;  %v1539_v37 = vld [vmem:[#allocation7 + $0x98] sm:$0xff]  }
  0xa9   : > { %v1538_v36 = vld [vmem:[#allocation7 + $0x90] sm:$0xff]   ;;  %v1540_v38 = vld [vmem:[#allocation7 + $0xa0] sm:$0xff]   ;;  %v1541_v39 = vld [vmem:[#allocation7 + $0xa8] sm:$0xff]   ;;  %p2297_p2 = scmp.ne.s32.totalorder %s2295_s8, 0 }
  0xaa   : > { %1327 = vmatpush3.bf16.msra.mxu0 %v1513_v3  ;;  %1347 = vmatpush3.bf16.msra.mxu1 %v1522_v8  ;;  %v1230_v40 = vld [vmem:[%s2249_s4] ss:$0 sm:$0xff]  ;;  %v1543_v51 = vld [vmem:[#allocation7 + $0xb8] sm:$0xff]   ;;  %v1544_v52 = vld [vmem:[%s2095_s15] sm:$0xff]  }
  0xab   : > { %1328 = vmatprep.subr.bf16.mxu0 %v1772_v0  ;;  %1348 = vmatprep.subr.bf16.mxu1 %v1772_v0  ;;  %v1542_v50 = vld [vmem:[#allocation7 + $0xb0] sm:$0xff]   ;;  %v1545_v53 = vld [vmem:[%s2095_s15 + $0x8] sm:$0xff]   ;;  %v1547_v55 = vld [vmem:[%s2095_s15 + $0x18] sm:$0xff]  }
  0xac   : > { %v1546_v54 = vld [vmem:[%s2095_s15 + $0x10] sm:$0xff]   ;;  %v1548_v56 = vld [vmem:[%s2095_s15 + $0x20] sm:$0xff]   ;;  %v1549_v57 = vld [vmem:[%s2095_s15 + $0x28] sm:$0xff]  }
  0xad   : > { %v1240_v58 = vld [vmem:[%s2249_s4 + $0x1] ss:$0 sm:$0xff]  ;;  %v1551_v6 = vld [vmem:[%s2095_s15 + $0x38] sm:$0xff]  }
  0xae   : > { %1329 = vmatpush3.bf16.msra.mxu0 %v1514_v5  ;;  %1349 = vmatpush3.bf16.msra.mxu1 %v1523_v10  ;;  %v1550_v5 = vld [vmem:[%s2095_s15 + $0x30] sm:$0xff]   ;;  %s1276_s15 = sshll.u32 %s1756_s27, 8  ;;  %s1670_s27 = scalar_lea.vmem %s2191_s24, 256 }
  0xaf   : > { %1330 = vmatprep.subr.bf16.mxu0 %v1772_v0  ;;  %1350 = vmatprep.subr.bf16.mxu1 %v1772_v0  ;;  %s2196_s6 = scalar_lea.hbm %s2296_s21, %s1276_s15  ;;  %p1671_p6 = scmp.ne.s32.totalorder %s2191_s24, %s1670_s27 }
  0xb0   : > { %p1678_p11 = scmp.lt.s32.totalorder %s1676_s7, %s1670_s27 }
  0xb1   : > { %p1672_p10 = pnand %p1671_p6, %p2297_p2 }
  0xb2   : > { %1331 = vmatpush3.bf16.msra.mxu0 %v1515_v7  ;;  %1351 = vmatpush3.bf16.msra.mxu1 %v1524_v12  ;;  %v1250_v7 = vld [vmem:[%s2249_s4 + $0x2] ss:$0 sm:$0xff]  ;;  %p1679_p5 = por %p1678_p11, %p1677_p3 }
  0xb3   : > { %1332 = vmatprep.subr.bf16.mxu0 %v1772_v0  ;;  %1352 = vmatprep.subr.bf16.mxu1 %v1772_v0  ;;  %p1673_p13 = pneg %p1672_p10 }
  0xb5   : > { %p1680_p8 = pnand %p1679_p5, %p1673_p13 }
  0xb6   : > { %1333 = vmatpush3.bf16.msra.mxu0 %v1516_v9  ;;  %1353 = vmatpush3.bf16.msra.mxu1 %v1525_v14 }
  0xb7   : > { %1334 = vmatprep.subr.bf16.mxu0 %v1772_v0  ;;  %1354 = vmatprep.subr.bf16.mxu1 %v1772_v0 }
  0xba   : > { %1335 = vmatpush3.bf16.msra.mxu0 %v1517_v11  ;;  %1355 = vmatpush3.bf16.msra.mxu1 %v1526_v16 }
  0xbb   : > { %1336 = vmatprep.subr.bf16.mxu0 %v1772_v0  ;;  %1356 = vmatprep.subr.bf16.mxu1 %v1772_v0 }
  0xbe   : > { %1337 = vmatpush3.bf16.msra.mxu0 %v1518_v13  ;;  %1357 = vmatpush3.bf16.msra.mxu1 %v1527_v17 }
  0xbf   : > { %1362 = vmatprep.subr.bf16.mxu0 %v1772_v0  ;;  %1382 = vmatprep.subr.bf16.mxu1 %v1772_v0 }
  0xc1   : > { %1339 = vmatmul.mubr.bf16.vlgmr.msra.gmra.mrb[0].mxu0 %v1519_v15 }
  0xc2   : > { %1378 = vmatprep.mubr.msk.bf16.mxu0 %vm1773_vm0, %v1772_v0  ;;  %1363 = vmatpush3.bf16.msra.mxu0 %v1528_v18 }
  0xc3   : > { %1364 = vmatprep.subr.bf16.mxu0 %v1772_v0 }
  0xc6   : > { %1365 = vmatpush3.bf16.msra.mxu0 %v1529_v19 }
  0xc7   : > { %1366 = vmatprep.subr.bf16.mxu0 %v1772_v0 }
  0xca   : > { %1367 = vmatpush3.bf16.msra.mxu0 %v1530_v20 }
  0xcb   : > { %1368 = vmatprep.subr.bf16.mxu0 %v1772_v0 }
  0xce   : > { %1369 = vmatpush3.bf16.msra.mxu0 %v1531_v21 }
  0xcf   : > { %1370 = vmatprep.subr.bf16.mxu0 %v1772_v0 }
  0xd2   : > { %1371 = vmatpush3.bf16.msra.mxu0 %v1532_v22 }
  0xd3   : > { %1372 = vmatprep.subr.bf16.mxu0 %v1772_v0 }
  0xd6   : > { %1373 = vmatpush3.bf16.msra.mxu0 %v1533_v23 }
  0xd7   : > { %1374 = vmatprep.subr.bf16.mxu0 %v1772_v0 }
  0xda   : > { %1375 = vmatpush3.bf16.msra.mxu0 %v1534_v32 }
  0xdb   : > { %1376 = vmatprep.subr.bf16.mxu0 %v1772_v0 }
  0xde   : > { %1377 = vmatpush3.bf16.msra.mxu0 %v1535_v33 }
  0xdf   : > { %1402 = vmatprep.subr.bf16.mxu0 %v1772_v0 }
 0x194   : > { %v553_v25 = vpop.f32.mrb[0].mxu0 }
 0x195   : > { %v1340_v26 = vpop.f32.mrb[1].mxu0  ;;  %v554_v28 = vadd.f32 %v1220_v24, %v553_v25 }
 0x196   : > { %v556_v27 = vpop.f32.mrb[2].mxu0 }
 0x197   : > { %v557_v29 = vadd.f32 %v1220_v24, %v556_v27  ;;  %v1341_v30 = vpop.f32.mrb[3].mxu0 }
 0x199   : > { %v560_v31 = vpack.c.bf16 %v557_v29, %v554_v28 }
 0x19b   : > { %1359 = vmatmul.mubr.bf16.vlgmr.msra.gmra.mrb[0].mxu1 %v560_v31 }
 0x19c   : > { %1398 = vmatprep.mubr.msk.bf16.mxu1 %vm1773_vm0, %v1772_v0  ;;  %1383 = vmatpush3.bf16.msra.mxu1 %v1536_v34 }
 0x19d   : > { %1384 = vmatprep.subr.bf16.mxu1 %v1772_v0 }
 0x1a0   : > { %1385 = vmatpush3.bf16.msra.mxu1 %v1537_v35 }
 0x1a1   : > { %1386 = vmatprep.subr.bf16.mxu1 %v1772_v0 }
 0x1a4   : > { %1387 = vmatpush3.bf16.msra.mxu1 %v1538_v36 }
 0x1a5   : > { %1388 = vmatprep.subr.bf16.mxu1 %v1772_v0 }
 0x1a8   : > { %1389 = vmatpush3.bf16.msra.mxu1 %v1539_v37 }
 0x1a9   : > { %1390 = vmatprep.subr.bf16.mxu1 %v1772_v0 }
 0x1ac   : > { %1391 = vmatpush3.bf16.msra.mxu1 %v1540_v38 }
 0x1ad   : > { %1392 = vmatprep.subr.bf16.mxu1 %v1772_v0 }
 0x1b0   : > { %1393 = vmatpush3.bf16.msra.mxu1 %v1541_v39 }
 0x1b1   : > { %1394 = vmatprep.subr.bf16.mxu1 %v1772_v0 }
 0x1b4   : > { %1395 = vmatpush3.bf16.msra.mxu1 %v1542_v50 }
 0x1b5   : > { %1396 = vmatprep.subr.bf16.mxu1 %v1772_v0 }
 0x1b8   : > { %1397 = vmatpush3.bf16.msra.mxu1 %v1543_v51 }
 0x26e   : > { %v666_v41 = vpop.f32.mrb[0].mxu1 }
 0x26f   : > { %v667_v42 = vadd.f32 %v1230_v40, %v666_v41  ;;  %v1360_v43 = vpop.f32.mrb[1].mxu1 }
 0x270   : > { %v669_v44 = vpop.f32.mrb[2].mxu1 }
 0x271   : > { %v670_v45 = vadd.f32 %v1230_v40, %v669_v44  ;;  %v1361_v46 = vpop.f32.mrb[3].mxu1  ;;  %v673_v47 = vmax.f32 %v667_v42, 0.0 }
 0x273   : > { %v674_v48 = vmax.f32 %v670_v45, 0.0 }
 0x275   : > { %v675_v49 = vpack.c.bf16 %v674_v48, %v673_v47 }
 0x277   : > { %1379 = vmatmul.mubr.bf16.vlgmr.msra.gmra.mrb[4].mxu0 %v675_v49 }
 0x278   : > { %1418 = vmatprep.mubr.msk.bf16.mxu0 %vm1773_vm0, %v1772_v0  ;;  %1403 = vmatpush3.bf16.msra.mxu0 %v1544_v52 }
 0x279   : > { %1404 = vmatprep.subr.bf16.mxu0 %v1772_v0 }
 0x27c   : > { %1405 = vmatpush3.bf16.msra.mxu0 %v1545_v53 }
 0x27d   : > { %1406 = vmatprep.subr.bf16.mxu0 %v1772_v0 }
 0x280   : > { %1407 = vmatpush3.bf16.msra.mxu0 %v1546_v54 }
 0x281   : > { %1408 = vmatprep.subr.bf16.mxu0 %v1772_v0 }
 0x284   : > { %1409 = vmatpush3.bf16.msra.mxu0 %v1547_v55 }
 0x285   : > { %1410 = vmatprep.subr.bf16.mxu0 %v1772_v0 }
 0x288   : > { %1411 = vmatpush3.bf16.msra.mxu0 %v1548_v56 }
 0x289   : > { %1412 = vmatprep.subr.bf16.mxu0 %v1772_v0 }
 0x28c   : > { %1413 = vmatpush3.bf16.msra.mxu0 %v1549_v57 }
 0x28d   : > { %1414 = vmatprep.subr.bf16.mxu0 %v1772_v0 }
 0x290   : > { %1415 = vmatpush3.bf16.msra.mxu0 %v1550_v5 }
 0x291   : > { %1416 = vmatprep.subr.bf16.mxu0 %v1772_v0  ;;  %v1259_v0 = vld [vmem:[%s437_s19] ss:$0 sm:$0xff] }
 0x294   : > { %1417 = vmatpush3.bf16.msra.mxu0 %v1551_v6 }
 0x34a   : > { %v783_v59 = vpop.f32.mrb[4].mxu0 }
 0x34b   : > { %v784_v60 = vadd.f32 %v1240_v58, %v783_v59  ;;  %v1380_v61 = vpop.f32.mrb[5].mxu0 }
 0x34c   : > { %v786_v62 = vpop.f32.mrb[6].mxu0 }
 0x34d   : > { %v787_v63 = vadd.f32 %v1240_v58, %v786_v62  ;;  %v1381_v1 = vpop.f32.mrb[7].mxu0  ;;  %v790_v2 = vmax.f32 %v784_v60, 0.0 }
 0x34f   : > { %v791_v3 = vmax.f32 %v787_v63, 0.0 }
 0x351   : > { %v792_v4 = vpack.c.bf16 %v791_v3, %v790_v2 }
 0x353   : > { %1399 = vmatmul.mubr.bf16.vlgmr.msra.gmra.mrb[4].mxu1 %v792_v4 }
 0x426   : > { %v900_v8 = vpop.f32.mrb[4].mxu1 }
 0x427   : > { %v901_v9 = vadd.f32 %v1250_v7, %v900_v8  ;;  %v1400_v10 = vpop.f32.mrb[5].mxu1 }
 0x428   : > { %v903_v11 = vpop.f32.mrb[6].mxu1 }
 0x429   : > { %v904_v12 = vadd.f32 %v1250_v7, %v903_v11  ;;  %v1401_v13 = vpop.f32.mrb[7].mxu1  ;;  %v907_v14 = vmax.f32 %v901_v9, 0.0 }
 0x42b   : > { %v908_v15 = vmax.f32 %v904_v12, 0.0 }
 0x42d   : > { %v909_v16 = vpack.c.bf16 %v908_v15, %v907_v14 }
 0x42f   : > { %1419 = vmatmul.mubr.bf16.vlgmr.msra.gmra.mrb[8].mxu0 %v909_v16 }
 0x502   : > { %v1015_v17 = vpop.f32.mrb[8].mxu0 }
 0x503   : > { %v1016_v18 = vadd.f32 %v1259_v0, %v1015_v17  ;;  %v1420_v19 = vpop.f32.mrb[9].mxu0 }
 0x504   : > { %v1018_v20 = vpop.f32.mrb[10].mxu0 }
 0x505   : > { %1022 = vst [vmem:[%s430_s9] sm:$0xff] %v1016_v18  ;;  %v1019_v21 = vadd.f32 %v1259_v0, %v1018_v20  ;;  %v1421_v22 = vpop.f32.mrb[11].mxu0 }
 0x507   : > { %1023 = vst [vmem:[%s430_s9 + $0x8] sm:$0xff] %v1019_v21 }
 0x508   : > { %1683 = shalt.err (!%p1680_p8)
}
 0x509   : > { %s1684_s0 = scalar_lea.hbm %s2196_s6, 256  ;;  %s1688_s10 = scalar_lea.hbm %s2296_s21, 512 }
 0x50a   : > { %p1685_p12 = scmp.ne.s32.totalorder %s2196_s6, %s1684_s0  ;;  %p1689_p9 = scmp.lt.u32.totalorder %s2196_s6, %s2296_s21 }
 0x50b   : > { %p1690_p1 = scmp.lt.u32.totalorder %s1688_s10, %s1684_s0  ;;  %p1692_p6 = scmp.lt.u32.totalorder %s1684_s0, %s2196_s6 }
 0x50c   : > { %p1686_p0 = pnand %p1685_p12, %p2297_p2 }
 0x50d   : > { %p1691_p4 = por %p1690_p1, %p1689_p9 }
 0x50e   : > { %p1687_p7 = pneg %p1686_p0 }
 0x50f   : > { %p1693_p10 = por %p1692_p6, %p1691_p4 }
 0x511   : > { %p1694_p13 = pnand %p1693_p10, %p1687_p7 }
 0x513   : > { %1697 = shalt.err (!%p1694_p13)
}
 0x514   : > { %s1775_s19 = smov 128   ;;  %s1776_s9 = smov 8  }
 0x515   : > { %1432 = dma.vmem_to_hbm [thread:$0]  (%p2297_p2), %s2191_s24, 256, %s2196_s6, %s1025_s30, %s1775_s19, %s1775_s19, %s1776_s9  }
 0x516 PF: > { %s2298_s15 = sld [smem:[#allocation16_spill]]  ;;  %s2299_s11 = sld [smem:[#allocation18_spill]] }
 0x517   : > { %p2301_p11 = scmp.ge.s32.totalorder %s1764_s29, 2 }
 0x51c   : > { %s1055_s12 = sand.u32 1, %s2298_s15   ;;  %p2300_p3 = scmp.ne.s32.totalorder %s2299_s11, 0 }
 0x51d   : > { %s1056_s27 = scalar_lea.sflag [#allocation4], %s1055_s12 }
 0x51e   : > { %p1449_p5 = pnand %p2301_p11, %p2300_p3 }
 0x520   : > { %1739 = dma.done.wait (!%p1449_p5), %s1056_s27, 256  }
 0x521   : > { %1741 = vsyncadd (!%p1449_p5), %s1056_s27, 4294967040  ;;  %s29_s29 = sadd.s32 1, %s1764_s29   ;;  %s2302_s24 = smov %s1748_s25 }
 0x522   : > { %p26_p8 = scmp.ge.s32.totalorder %s29_s29, 4   ;;  %s2303_s25 = smov %s1752_s26 }
 0x523   : > { %s2304_s26 = smov %s1943_s16  ;;  %s2305_s27 = smov %s1760_s28 }
 0x524   : > { %s2306_s28 = smov %s2308_s18  ;;  %28 = sbr.rel (!%p26_p8) target bundleno = 15 (0xf), region = 133 }
 0x52b   :  { %1061 = vsyncpa [#allocation3], 1 }
 0x52c   :  { %1063 = vsyncpa [#allocation3 + $0x1], 1 }
 0x52d   :  { %1064 = vsyncpa [#allocation6], 1 }
 0x52e   :  { %1066 = vsyncpa [#allocation6 + $0x1], 1 }
 0x52f   :  { %1067 = vsyncpa [#allocation9], 1 }
 0x530   :  { %1069 = vsyncpa [#allocation9 + $0x1], 1 }
 0x531   :  { %1070 = vsyncpa [#allocation4], 1 }
 0x532   :  { %1072 = vsyncpa [#allocation4 + $0x1], 1 }

</bundles_post_ra>
